<compile_context>
chip_gen: v6e
topology: v6e:2x2x1
jax: 0.10.0
libtpu: 0.0.40
codegen_flags: <defaults>
</compile_context>

<pallas_src>
import functools

import jax
import jax.numpy as jnp
from jax import lax
from jax.experimental import pallas as pl
from jax.experimental.pallas import tpu as pltpu


MATMUL_DTYPE = jnp.bfloat16   # MXU-native operand dtype; accumulation stays f32.
ACT_DTYPE = jnp.bfloat16      # pre-gates / per-timestep y stored in bf16.


def _round_up(x, m):
    return (x + m - 1) // m * m


def _pad_gate_cols(w, h, hp):
    """Last axis is 4 gate blocks of size h; pad each block to hp with zeros."""
    if hp == h:
        return w
    parts = []
    for g in range(4):
        blk = w[..., g * h:(g + 1) * h]
        pad = [(0, 0)] * (blk.ndim - 1) + [(0, hp - h)]
        parts.append(jnp.pad(blk, pad))
    return jnp.concatenate(parts, axis=-1)


def _is_multi_tensorcore():
    """True only on chips with >1 TensorCore (v7x); v5e/v6e are single-TC."""
    try:
        kind = jax.devices()[0].device_kind.lower()
    except Exception:
        return False
    return "v7" in kind


def _vmem_limit_bytes(needed):
    """Request only what the kernel's buffers need (+ headroom), never full VMEM."""
    try:
        cap = int(pltpu.get_tpu_info().vmem_capacity_bytes)
    except Exception:
        cap = 128 * 1024 * 1024      # v5e/v6e physical per-core VMEM
    limit = needed + 8 * 1024 * 1024  # headroom for compiler-internal scratch
    limit = max(limit, 16 * 1024 * 1024)
    return int(min(limit, (3 * cap) // 4))


def _lstm_recurrent_kernel(pg_ref, wh_ref, h0_ref, c0_ref,
                           y_ref, hN_ref, cN_ref,
                           *, hidden_pad, time_chunk, seq_len, needs_mask):
    """Sequential part of one LSTM layer.

    grid = (num_batch_blocks [parallel], num_time_chunks [arbitrary]).

    pg_ref : (TC, Bb, 4*Hp) bf16  pre-computed x@Wx + (b_ih+b_hh) for this chunk
    wh_ref : (Hp, 4*Hp)    bf16   hidden->gates weights (pre-transposed, padded)
    h0_ref : (Bb, Hp)      f32    initial hidden state
    c0_ref : (Bb, Hp)      f32    initial cell state
    y_ref  : (TC, Bb, Hp)  bf16   per-timestep hidden outputs
    hN_ref : (Bb, Hp)      f32    running/final hidden state (resident over time)
    cN_ref : (Bb, Hp)      f32    running/final cell state   (resident over time)
    """
    Hp = hidden_pad
    chunk = pl.program_id(1)

    @pl.when(chunk == 0)
    def _():
        hN_ref[...] = h0_ref[...]
        cN_ref[...] = c0_ref[...]

    wh = wh_ref[...]  # held in VMEM/vregs across the unrolled chunk

    def step(t_local, carry):
        h, c = carry
        # PyTorch LSTM: gates = x@W_ih.T + b_ih + h@W_hh.T + b_hh ; order i,f,g,o
        gates = jnp.dot(h.astype(wh.dtype), wh,
                        preferred_element_type=jnp.float32)
        gates = gates + pg_ref[t_local].astype(jnp.float32)
        # sigmoid(x) = 0.5*tanh(0.5*x) + 0.5  (one EUP op instead of exp+recip)
        i_g = 0.5 * jnp.tanh(0.5 * gates[:, 0 * Hp:1 * Hp]) + 0.5
        f_g = 0.5 * jnp.tanh(0.5 * gates[:, 1 * Hp:2 * Hp]) + 0.5
        g_g = jnp.tanh(gates[:, 2 * Hp:3 * Hp])
        o_g = 0.5 * jnp.tanh(0.5 * gates[:, 3 * Hp:4 * Hp]) + 0.5
        c_new = f_g * c + i_g * g_g
        h_new = o_g * jnp.tanh(c_new)
        y_ref[t_local] = h_new.astype(y_ref.dtype)

        if needs_mask:
            # Only present when T % TC != 0: keep the carried state frozen on
            # padded (past-the-end) timesteps so hN/cN match the true last step.
            t_global = chunk * time_chunk + t_local
            valid = t_global < seq_len
            h = jnp.where(valid, h_new, h)
            c = jnp.where(valid, c_new, c)
        else:
            h, c = h_new, c_new
        return h, c

    h_fin, c_fin = lax.fori_loop(
        0, time_chunk, step, (hN_ref[...], cN_ref[...]), unroll=True)

    # Write the carried state every grid step (cheap; the resident block is
    # flushed to HBM once per batch block at the end of the time axis).
    hN_ref[...] = h_fin
    cN_ref[...] = c_fin


def lstm_layer(x_pad, seq_len, batch, in_features, wx, wh, b, h0, c0,
               *, time_chunk=8):
    """One stacked-LSTM layer operating on (possibly) padded activations.

    x_pad : (Tx, Bx, Ix) f32/bf16 with Tx >= seq_len, Bx >= batch, Ix >= in_features.
            Extra feature columns are neutralized by zero-padded Wx rows; extra
            time/batch rows never mix with valid ones.
    wx : (in_features, 4H), wh : (H, 4H), b : (4H,), h0/c0 : (batch, H)
    Returns (y_pad (Tp, Bp, Hp) bf16, h_last (Bp, Hp) f32, c_last (Bp, Hp) f32, Hp).
    """
    Tx, Bx, Ix = x_pad.shape
    H = wh.shape[0]
    assert wx.shape == (in_features, 4 * H) and wh.shape == (H, 4 * H)
    assert Ix >= in_features

    # ---- vreg-aligned padding ------------------------------------------------
    Hp = _round_up(H, 128)          # lane axis (per gate block)
    Bp = _round_up(batch, 8)        # sublane axis
    num_b_blocks = 1
    if _is_multi_tensorcore() and batch >= 16:
        # 2 blocks for the 2 TensorCores; each block a multiple of 16 sublanes
        # so bf16 blocks stay tile-aligned.
        num_b_blocks = 2
        Bp = _round_up(batch, 32)
    Bb = Bp // num_b_blocks

    tc = max(1, min(time_chunk, seq_len))
    num_chunks = pl.cdiv(seq_len, tc)
    Tp = num_chunks * tc
    needs_mask = (Tp != seq_len)

    if Bx < Bp:
        x_pad = jnp.pad(x_pad, ((0, 0), (0, Bp - Bx), (0, 0)))
    elif Bx > Bp:
        x_pad = x_pad[:, :Bp, :]

    # Weights: pad Wx rows to Ix (zero rows absorb padded input columns),
    # gate columns to Hp (zero-padded gate columns stay provably inert).
    wx_full = jnp.pad(wx, ((0, Ix - in_features), (0, 0)))     # (Ix, 4H)
    wx_p = _pad_gate_cols(wx_full, H, Hp)                      # (Ix, 4Hp)
    b_p = _pad_gate_cols(b.reshape(1, 4 * H), H, Hp)           # (1, 4Hp)
    wh_p = _pad_gate_cols(wh, H, Hp)                           # (H, 4Hp)
    wh_p = jnp.pad(wh_p, ((0, Hp - H), (0, 0)))                # (Hp, 4Hp)
    wh_bf = wh_p.astype(MATMUL_DTYPE)

    h0_p = jnp.pad(h0.astype(jnp.float32), ((0, Bp - batch), (0, Hp - H)))
    c0_p = jnp.pad(c0.astype(jnp.float32), ((0, Bp - batch), (0, Hp - H)))

    # ---- hoisted input projection: one big MXU matmul over all T*B rows ------
    pre = jnp.dot(
        x_pad.reshape(Tx * Bp, Ix).astype(MATMUL_DTYPE),
        wx_p.astype(MATMUL_DTYPE),
        preferred_element_type=jnp.float32,
    ) + b_p.astype(jnp.float32)
    pre = pre.astype(ACT_DTYPE).reshape(Tx, Bp, 4 * Hp)        # bf16 pre-gates
    if Tx < Tp:
        pre = jnp.pad(pre, ((0, Tp - Tx), (0, 0), (0, 0)))     # (Tp, Bp, 4Hp)

    kernel = functools.partial(
        _lstm_recurrent_kernel,
        hidden_pad=Hp, time_chunk=tc, seq_len=seq_len, needs_mask=needs_mask)

    # VMEM budget from the actual buffer sizes (double-buffered pipeline).
    vmem_needed = (
        2 * tc * Bb * 4 * Hp * 2      # pre-gates (bf16) x2 buffers
        + 2 * tc * Bb * Hp * 2        # y (bf16) x2 buffers
        + 2 * Hp * 4 * Hp * 2         # Wh (bf16) x2 buffers (constant index)
        + 4 * 2 * Bb * Hp * 4         # h0/c0/hN/cN (f32) x2 buffers each
    )
    vmem_limit = _vmem_limit_bytes(vmem_needed)

    grid_spec = pltpu.PrefetchScalarGridSpec(
        num_scalar_prefetch=0,
        grid=(num_b_blocks, num_chunks),
        in_specs=[
            pl.BlockSpec((tc, Bb, 4 * Hp), lambda bi, ti: (ti, bi, 0)),  # pre-gates
            pl.BlockSpec((Hp, 4 * Hp), lambda bi, ti: (0, 0)),           # Wh (bf16)
            pl.BlockSpec((Bb, Hp), lambda bi, ti: (bi, 0)),              # h0
            pl.BlockSpec((Bb, Hp), lambda bi, ti: (bi, 0)),              # c0
        ],
        out_specs=[
            pl.BlockSpec((tc, Bb, Hp), lambda bi, ti: (ti, bi, 0)),      # y (bf16)
            pl.BlockSpec((Bb, Hp), lambda bi, ti: (bi, 0)),              # h_last
            pl.BlockSpec((Bb, Hp), lambda bi, ti: (bi, 0)),              # c_last
        ],
    )

    y_p, hN_p, cN_p = pl.pallas_call(
        kernel,
        grid_spec=grid_spec,
        out_shape=(
            jax.ShapeDtypeStruct((Tp, Bp, Hp), ACT_DTYPE),
            jax.ShapeDtypeStruct((Bp, Hp), jnp.float32),
            jax.ShapeDtypeStruct((Bp, Hp), jnp.float32),
        ),
        compiler_params=pltpu.CompilerParams(
            dimension_semantics=("parallel", "arbitrary"),
            vmem_limit_bytes=vmem_limit,
        ),
    )(pre, wh_bf, h0_p, c0_p)

    return y_p, hN_p, cN_p, Hp


def init_params(key, ntoken, ninp, nhid, nlayers):
    """Deterministic parameter init mirroring the PyTorch module's shapes."""
    keys = jax.random.split(key, 1 + 4 * nlayers)
    params = {}
    # encoder.weight ~ U(-0.1, 0.1), shape (ntoken, ninp)
    params["encoder"] = jax.random.uniform(
        keys[0], (ntoken, ninp), jnp.float32, -0.1, 0.1)
    layers = []
    for l in range(nlayers):
        in_sz = ninp if l == 0 else nhid
        out_sz = nhid  # tie_weights=False -> every layer outputs nhid
        k = 1.0 / jnp.sqrt(out_sz)
        kw = keys[1 + 4 * l: 1 + 4 * (l + 1)]
        w_ih = jax.random.uniform(kw[0], (4 * out_sz, in_sz), jnp.float32, -k, k)
        w_hh = jax.random.uniform(kw[1], (4 * out_sz, out_sz), jnp.float32, -k, k)
        b_ih = jax.random.uniform(kw[2], (4 * out_sz,), jnp.float32, -k, k)
        b_hh = jax.random.uniform(kw[3], (4 * out_sz,), jnp.float32, -k, k)
        layers.append({
            # pre-transpose so we compute x @ Wx + h @ Wh
            "wx": w_ih.T,                 # (in_sz, 4H)
            "wh": w_hh.T,                 # (H, 4H)
            "b": b_ih + b_hh,             # (4H,)
        })
    params["layers"] = layers
    return params


def rnn_model_forward(params, tokens, hidden, *, time_chunk=8):
    """Eval-mode forward of RNNModel (rnn_type='LSTM').

    tokens : (T, B) int32
    hidden : list of (h0 (B,H), c0 (B,H)) per layer
    returns (result (T*B, H_last), new_hidden)
    """
    T, B = tokens.shape
    # Embedding lookup (glue; dropoute/dropouti are identity at eval time).
    emb = jnp.take(params["encoder"], tokens, axis=0)  # (T, B, ninp)

    x_pad = emb                      # padded activations are threaded layer→layer
    in_features = emb.shape[-1]
    new_hidden = []
    H = in_features
    # TODO(synk): fuse the layer stack (wavefront over (layer, time_chunk)) so
    # layer l+1 consumes layer l's y chunk from VMEM instead of HBM.
    for l, layer in enumerate(params["layers"]):
        h0, c0 = hidden[l]
        H = layer["wh"].shape[0]
        x_pad, hN_p, cN_p, _ = lstm_layer(
            x_pad, T, B, in_features, layer["wx"], layer["wh"], layer["b"],
            h0, c0, time_chunk=time_chunk)
        new_hidden.append((hN_p[:B, :H], cN_p[:B, :H]))
        in_features = H
        # lockdrop(dropouth) is identity in eval mode.

    # lockdrop(dropout) identity in eval mode; decoder NOT applied in forward().
    raw_output = x_pad[:T, :B, :H].astype(jnp.float32)
    result = raw_output.reshape(T * B, H)
    return result, new_hidden


# ---------------- pure-JAX reference (f32, unpadded) for validation ----------
def _lstm_layer_ref(x, wx, wh, b, h0, c0):
    H = wh.shape[0]

    def step(carry, x_t):
        h, c = carry
        gates = x_t @ wx + h @ wh + b
        i = jax.nn.sigmoid(gates[:, 0 * H:1 * H])
        f = jax.nn.sigmoid(gates[:, 1 * H:2 * H])
        g = jnp.tanh(gates[:, 2 * H:3 * H])
        o = jax.nn.sigmoid(gates[:, 3 * H:4 * H])
        c = f * c + i * g
        h = o * jnp.tanh(c)
        return (h, c), h

    (h, c), ys = lax.scan(step, (h0, c0), x)
    return ys, h, c


def rnn_model_forward_ref(params, tokens, hidden):
    emb = jnp.take(params["encoder"], tokens, axis=0)
    raw_output = emb
    new_hidden = []
    for l, layer in enumerate(params["layers"]):
        h0, c0 = hidden[l]
        raw_output, h_last, c_last = _lstm_layer_ref(
            raw_output, layer["wx"], layer["wh"], layer["b"], h0, c0)
        new_hidden.append((h_last, c_last))
    T, B, H = raw_output.shape
    return raw_output.reshape(T * B, H), new_hidden


if __name__ == "__main__":
    # Small shapes consistent with the module.
    ntoken, ninp, nhid, nlayers = 50, 16, 32, 2
    T, B = 8, 2

    key = jax.random.PRNGKey(0)
    k_param, k_tok = jax.random.split(key)
    params = init_params(k_param, ntoken, ninp, nhid, nlayers)

    tokens = jax.random.randint(k_tok, (T, B), 0, ntoken, dtype=jnp.int32)
    # init_hidden: zeros, (B, H) per layer (PyTorch's leading 1 squeezed).
    hidden = [(jnp.zeros((B, nhid), jnp.float32),
               jnp.zeros((B, nhid), jnp.float32)) for _ in range(nlayers)]

    fwd = jax.jit(rnn_model_forward)
    result, new_hidden = fwd(params, tokens, hidden)
    jax.block_until_ready(result)
    for h, c in new_hidden:
        jax.block_until_ready(h)
        jax.block_until_ready(c)

    assert result.shape == (T * B, nhid)

    # Validate against the pure-JAX f32 reference (loose tol: bf16 matmuls,
    # bf16 pre-gates / bf16 y write-back).
    ref_result, ref_hidden = rnn_model_forward_ref(params, tokens, hidden)
    ok = bool(jnp.allclose(result, ref_result, atol=2e-2, rtol=2e-2))
    for (h, c), (rh, rc) in zip(new_hidden, ref_hidden):
        ok = ok and bool(jnp.allclose(h, rh, atol=2e-2, rtol=2e-2))
        ok = ok and bool(jnp.allclose(c, rc, atol=2e-2, rtol=2e-2))
    if not ok:
        raise AssertionError("Pallas LSTM output mismatch vs reference")

    print("KERNEL_OK")
</pallas_src>

<mosaic_0001>
module attributes {stable_mosaic.version = 11 : i64} {
  func.func @_lstm_recurrent_kernel(%arg0: i32, %arg1: i32, %arg2: memref<8x8x512xbf16, #tpu.memory_space<vmem>>, %arg3: memref<128x512xbf16, #tpu.memory_space<vmem>>, %arg4: memref<8x128xf32, #tpu.memory_space<vmem>>, %arg5: memref<8x128xf32, #tpu.memory_space<vmem>>, %arg6: memref<8x8x128xbf16, #tpu.memory_space<vmem>>, %arg7: memref<8x128xf32, #tpu.memory_space<vmem>>, %arg8: memref<8x128xf32, #tpu.memory_space<vmem>>) attributes {dimension_semantics = [#tpu.dimension_semantics<parallel>, #tpu.dimension_semantics<arbitrary>], iteration_bounds = array<i64: 1, 1>, scalar_prefetch = 0 : i64, scratch_operands = 0 : i64, tpu.core_type = #tpu.core_type<tc>, window_params = [{transform_indices = @transform_0, window_bounds = array<i64: 8, 8, 512>}, {pipeline_mode = #tpu.pipeline_mode<synchronous>, transform_indices = @transform_1, window_bounds = array<i64: 128, 512>}, {transform_indices = @transform_2, window_bounds = array<i64: 8, 128>}, {transform_indices = @transform_3, window_bounds = array<i64: 8, 128>}, {transform_indices = @transform_4, window_bounds = array<i64: 8, 8, 128>}, {transform_indices = @transform_5, window_bounds = array<i64: 8, 128>}, {transform_indices = @transform_6, window_bounds = array<i64: 8, 128>}]} {
    %c0_i32 = arith.constant 0 : i32
    %0 = arith.cmpi eq, %arg1, %c0_i32 : i32
    %1 = arith.extui %0 : i1 to i32
    %c0_i32_0 = arith.constant 0 : i32
    %2 = arith.cmpi ne, %1, %c0_i32_0 : i32
    scf.if %2 {
      %c0_122 = arith.constant 0 : index
      %c0_123 = arith.constant 0 : index
      %352 = vector.load %arg4[%c0_122, %c0_123] : memref<8x128xf32, #tpu.memory_space<vmem>>, vector<8x128xf32>
      %c0_124 = arith.constant 0 : index
      %c0_125 = arith.constant 0 : index
      %353 = vector.load %arg7[%c0_124, %c0_125] : memref<8x128xf32, #tpu.memory_space<vmem>>, vector<8x128xf32>
      tpu.vector_store %arg7[%c0_124, %c0_125], %352 {strides = array<i32>} : memref<8x128xf32, #tpu.memory_space<vmem>>, vector<8x128xf32>,
      %c0_126 = arith.constant 0 : index
      %c0_127 = arith.constant 0 : index
      %354 = vector.load %arg5[%c0_126, %c0_127] : memref<8x128xf32, #tpu.memory_space<vmem>>, vector<8x128xf32>
      %c0_128 = arith.constant 0 : index
      %c0_129 = arith.constant 0 : index
      %355 = vector.load %arg8[%c0_128, %c0_129] : memref<8x128xf32, #tpu.memory_space<vmem>>, vector<8x128xf32>
      tpu.vector_store %arg8[%c0_128, %c0_129], %354 {strides = array<i32>} : memref<8x128xf32, #tpu.memory_space<vmem>>, vector<8x128xf32>,
    } else {
    }
    %c0 = arith.constant 0 : index
    %c0_1 = arith.constant 0 : index
    %3 = vector.load %arg3[%c0, %c0_1] : memref<128x512xbf16, #tpu.memory_space<vmem>>, vector<128x512xbf16>
    %c0_2 = arith.constant 0 : index
    %c0_3 = arith.constant 0 : index
    %4 = vector.load %arg7[%c0_2, %c0_3] : memref<8x128xf32, #tpu.memory_space<vmem>>, vector<8x128xf32>
    %c0_4 = arith.constant 0 : index
    %c0_5 = arith.constant 0 : index
    %5 = vector.load %arg8[%c0_4, %c0_5] : memref<8x128xf32, #tpu.memory_space<vmem>>, vector<8x128xf32>
    %c0_i32_6 = arith.constant 0 : i32
    %6 = arith.truncf %4 : vector<8x128xf32> to vector<8x128xbf16>
    %cst = arith.constant dense<0.000000e+00> : vector<8x512xf32>
    %7 = tpu.matmul %6, %3, %cst {dimension_numbers = #tpu.dot_dimension_numbers<[1], [0], [0], [1], [0, 0, 1, 1], [], []>} : vector<8x128xbf16>, vector<128x512xbf16>, vector<8x512xf32> -> vector<8x512xf32>
    %8 = arith.index_cast %c0_i32_6 : i32 to index
    %c0_7 = arith.constant 0 : index
    %c0_8 = arith.constant 0 : index
    %9 = vector.load %arg2[%8, %c0_7, %c0_8] : memref<8x8x512xbf16, #tpu.memory_space<vmem>>, vector<1x8x512xbf16>
    %10 = vector.shape_cast %9 : vector<1x8x512xbf16> to vector<8x512xbf16>
    %11 = arith.extf %10 : vector<8x512xbf16> to vector<8x512xf32>
    %12 = arith.addf %7, %11 : vector<8x512xf32>
    %13 = vector.extract_strided_slice %12 {offsets = [0, 0], sizes = [8, 128], strides = [1, 1]} : vector<8x512xf32> to vector<8x128xf32>
    %cst_9 = arith.constant 5.000000e-01 : f32
    %14 = vector.broadcast %cst_9 : f32 to vector<8x128xf32>
    %15 = arith.mulf %14, %13 : vector<8x128xf32>
    %16 = math.tanh %15 : vector<8x128xf32>
    %cst_10 = arith.constant 5.000000e-01 : f32
    %17 = vector.broadcast %cst_10 : f32 to vector<8x128xf32>
    %18 = arith.mulf %17, %16 : vector<8x128xf32>
    %cst_11 = arith.constant 5.000000e-01 : f32
    %19 = vector.broadcast %cst_11 : f32 to vector<8x128xf32>
    %20 = arith.addf %18, %19 : vector<8x128xf32>
    %21 = vector.extract_strided_slice %12 {offsets = [0, 128], sizes = [8, 128], strides = [1, 1]} : vector<8x512xf32> to vector<8x128xf32>
    %cst_12 = arith.constant 5.000000e-01 : f32
    %22 = vector.broadcast %cst_12 : f32 to vector<8x128xf32>
    %23 = arith.mulf %22, %21 : vector<8x128xf32>
    %24 = math.tanh %23 : vector<8x128xf32>
    %cst_13 = arith.constant 5.000000e-01 : f32
    %25 = vector.broadcast %cst_13 : f32 to vector<8x128xf32>
    %26 = arith.mulf %25, %24 : vector<8x128xf32>
    %cst_14 = arith.constant 5.000000e-01 : f32
    %27 = vector.broadcast %cst_14 : f32 to vector<8x128xf32>
    %28 = arith.addf %26, %27 : vector<8x128xf32>
    %29 = vector.extract_strided_slice %12 {offsets = [0, 256], sizes = [8, 128], strides = [1, 1]} : vector<8x512xf32> to vector<8x128xf32>
    %30 = math.tanh %29 : vector<8x128xf32>
    %31 = vector.extract_strided_slice %12 {offsets = [0, 384], sizes = [8, 128], strides = [1, 1]} : vector<8x512xf32> to vector<8x128xf32>
    %cst_15 = arith.constant 5.000000e-01 : f32
    %32 = vector.broadcast %cst_15 : f32 to vector<8x128xf32>
    %33 = arith.mulf %32, %31 : vector<8x128xf32>
    %34 = math.tanh %33 : vector<8x128xf32>
    %cst_16 = arith.constant 5.000000e-01 : f32
    %35 = vector.broadcast %cst_16 : f32 to vector<8x128xf32>
    %36 = arith.mulf %35, %34 : vector<8x128xf32>
    %cst_17 = arith.constant 5.000000e-01 : f32
    %37 = vector.broadcast %cst_17 : f32 to vector<8x128xf32>
    %38 = arith.addf %36, %37 : vector<8x128xf32>
    %39 = arith.mulf %28, %5 : vector<8x128xf32>
    %40 = arith.mulf %20, %30 : vector<8x128xf32>
    %41 = arith.addf %39, %40 : vector<8x128xf32>
    %42 = math.tanh %41 : vector<8x128xf32>
    %43 = arith.mulf %38, %42 : vector<8x128xf32>
    %44 = arith.truncf %43 : vector<8x128xf32> to vector<8x128xbf16>
    %45 = arith.index_cast %c0_i32_6 : i32 to index
    %c0_18 = arith.constant 0 : index
    %c0_19 = arith.constant 0 : index
    %46 = vector.load %arg6[%45, %c0_18, %c0_19] : memref<8x8x128xbf16, #tpu.memory_space<vmem>>, vector<1x8x128xbf16>
    %47 = vector.shape_cast %46 : vector<1x8x128xbf16> to vector<8x128xbf16>
    %48 = vector.shape_cast %44 : vector<8x128xbf16> to vector<1x8x128xbf16>
    tpu.vector_store %arg6[%45, %c0_18, %c0_19], %48 {strides = array<i32>} : memref<8x8x128xbf16, #tpu.memory_space<vmem>>, vector<1x8x128xbf16>,
    %c1_i32 = arith.constant 1 : i32
    %49 = arith.truncf %43 : vector<8x128xf32> to vector<8x128xbf16>
    %cst_20 = arith.constant dense<0.000000e+00> : vector<8x512xf32>
    %50 = tpu.matmul %49, %3, %cst_20 {dimension_numbers = #tpu.dot_dimension_numbers<[1], [0], [0], [1], [0, 0, 1, 1], [], []>} : vector<8x128xbf16>, vector<128x512xbf16>, vector<8x512xf32> -> vector<8x512xf32>
    %51 = arith.index_cast %c1_i32 : i32 to index
    %c0_21 = arith.constant 0 : index
    %c0_22 = arith.constant 0 : index
    %52 = vector.load %arg2[%51, %c0_21, %c0_22] : memref<8x8x512xbf16, #tpu.memory_space<vmem>>, vector<1x8x512xbf16>
    %53 = vector.shape_cast %52 : vector<1x8x512xbf16> to vector<8x512xbf16>
    %54 = arith.extf %53 : vector<8x512xbf16> to vector<8x512xf32>
    %55 = arith.addf %50, %54 : vector<8x512xf32>
    %56 = vector.extract_strided_slice %55 {offsets = [0, 0], sizes = [8, 128], strides = [1, 1]} : vector<8x512xf32> to vector<8x128xf32>
    %cst_23 = arith.constant 5.000000e-01 : f32
    %57 = vector.broadcast %cst_23 : f32 to vector<8x128xf32>
    %58 = arith.mulf %57, %56 : vector<8x128xf32>
    %59 = math.tanh %58 : vector<8x128xf32>
    %cst_24 = arith.constant 5.000000e-01 : f32
    %60 = vector.broadcast %cst_24 : f32 to vector<8x128xf32>
    %61 = arith.mulf %60, %59 : vector<8x128xf32>
    %cst_25 = arith.constant 5.000000e-01 : f32
    %62 = vector.broadcast %cst_25 : f32 to vector<8x128xf32>
    %63 = arith.addf %61, %62 : vector<8x128xf32>
    %64 = vector.extract_strided_slice %55 {offsets = [0, 128], sizes = [8, 128], strides = [1, 1]} : vector<8x512xf32> to vector<8x128xf32>
    %cst_26 = arith.constant 5.000000e-01 : f32
    %65 = vector.broadcast %cst_26 : f32 to vector<8x128xf32>
    %66 = arith.mulf %65, %64 : vector<8x128xf32>
    %67 = math.tanh %66 : vector<8x128xf32>
    %cst_27 = arith.constant 5.000000e-01 : f32
    %68 = vector.broadcast %cst_27 : f32 to vector<8x128xf32>
    %69 = arith.mulf %68, %67 : vector<8x128xf32>
    %cst_28 = arith.constant 5.000000e-01 : f32
    %70 = vector.broadcast %cst_28 : f32 to vector<8x128xf32>
    %71 = arith.addf %69, %70 : vector<8x128xf32>
    %72 = vector.extract_strided_slice %55 {offsets = [0, 256], sizes = [8, 128], strides = [1, 1]} : vector<8x512xf32> to vector<8x128xf32>
    %73 = math.tanh %72 : vector<8x128xf32>
    %74 = vector.extract_strided_slice %55 {offsets = [0, 384], sizes = [8, 128], strides = [1, 1]} : vector<8x512xf32> to vector<8x128xf32>
    %cst_29 = arith.constant 5.000000e-01 : f32
    %75 = vector.broadcast %cst_29 : f32 to vector<8x128xf32>
    %76 = arith.mulf %75, %74 : vector<8x128xf32>
    %77 = math.tanh %76 : vector<8x128xf32>
    %cst_30 = arith.constant 5.000000e-01 : f32
    %78 = vector.broadcast %cst_30 : f32 to vector<8x128xf32>
    %79 = arith.mulf %78, %77 : vector<8x128xf32>
    %cst_31 = arith.constant 5.000000e-01 : f32
    %80 = vector.broadcast %cst_31 : f32 to vector<8x128xf32>
    %81 = arith.addf %79, %80 : vector<8x128xf32>
    %82 = arith.mulf %71, %41 : vector<8x128xf32>
    %83 = arith.mulf %63, %73 : vector<8x128xf32>
    %84 = arith.addf %82, %83 : vector<8x128xf32>
    %85 = math.tanh %84 : vector<8x128xf32>
    %86 = arith.mulf %81, %85 : vector<8x128xf32>
    %87 = arith.truncf %86 : vector<8x128xf32> to vector<8x128xbf16>
    %88 = arith.index_cast %c1_i32 : i32 to index
    %c0_32 = arith.constant 0 : index
    %c0_33 = arith.constant 0 : index
    %89 = vector.load %arg6[%88, %c0_32, %c0_33] : memref<8x8x128xbf16, #tpu.memory_space<vmem>>, vector<1x8x128xbf16>
    %90 = vector.shape_cast %89 : vector<1x8x128xbf16> to vector<8x128xbf16>
    %91 = vector.shape_cast %87 : vector<8x128xbf16> to vector<1x8x128xbf16>
    tpu.vector_store %arg6[%88, %c0_32, %c0_33], %91 {strides = array<i32>} : memref<8x8x128xbf16, #tpu.memory_space<vmem>>, vector<1x8x128xbf16>,
    %c2_i32 = arith.constant 2 : i32
    %92 = arith.truncf %86 : vector<8x128xf32> to vector<8x128xbf16>
    %cst_34 = arith.constant dense<0.000000e+00> : vector<8x512xf32>
    %93 = tpu.matmul %92, %3, %cst_34 {dimension_numbers = #tpu.dot_dimension_numbers<[1], [0], [0], [1], [0, 0, 1, 1], [], []>} : vector<8x128xbf16>, vector<128x512xbf16>, vector<8x512xf32> -> vector<8x512xf32>
    %94 = arith.index_cast %c2_i32 : i32 to index
    %c0_35 = arith.constant 0 : index
    %c0_36 = arith.constant 0 : index
    %95 = vector.load %arg2[%94, %c0_35, %c0_36] : memref<8x8x512xbf16, #tpu.memory_space<vmem>>, vector<1x8x512xbf16>
    %96 = vector.shape_cast %95 : vector<1x8x512xbf16> to vector<8x512xbf16>
    %97 = arith.extf %96 : vector<8x512xbf16> to vector<8x512xf32>
    %98 = arith.addf %93, %97 : vector<8x512xf32>
    %99 = vector.extract_strided_slice %98 {offsets = [0, 0], sizes = [8, 128], strides = [1, 1]} : vector<8x512xf32> to vector<8x128xf32>
    %cst_37 = arith.constant 5.000000e-01 : f32
    %100 = vector.broadcast %cst_37 : f32 to vector<8x128xf32>
    %101 = arith.mulf %100, %99 : vector<8x128xf32>
    %102 = math.tanh %101 : vector<8x128xf32>
    %cst_38 = arith.constant 5.000000e-01 : f32
    %103 = vector.broadcast %cst_38 : f32 to vector<8x128xf32>
    %104 = arith.mulf %103, %102 : vector<8x128xf32>
    %cst_39 = arith.constant 5.000000e-01 : f32
    %105 = vector.broadcast %cst_39 : f32 to vector<8x128xf32>
    %106 = arith.addf %104, %105 : vector<8x128xf32>
    %107 = vector.extract_strided_slice %98 {offsets = [0, 128], sizes = [8, 128], strides = [1, 1]} : vector<8x512xf32> to vector<8x128xf32>
    %cst_40 = arith.constant 5.000000e-01 : f32
    %108 = vector.broadcast %cst_40 : f32 to vector<8x128xf32>
    %109 = arith.mulf %108, %107 : vector<8x128xf32>
    %110 = math.tanh %109 : vector<8x128xf32>
    %cst_41 = arith.constant 5.000000e-01 : f32
    %111 = vector.broadcast %cst_41 : f32 to vector<8x128xf32>
    %112 = arith.mulf %111, %110 : vector<8x128xf32>
    %cst_42 = arith.constant 5.000000e-01 : f32
    %113 = vector.broadcast %cst_42 : f32 to vector<8x128xf32>
    %114 = arith.addf %112, %113 : vector<8x128xf32>
    %115 = vector.extract_strided_slice %98 {offsets = [0, 256], sizes = [8, 128], strides = [1, 1]} : vector<8x512xf32> to vector<8x128xf32>
    %116 = math.tanh %115 : vector<8x128xf32>
    %117 = vector.extract_strided_slice %98 {offsets = [0, 384], sizes = [8, 128], strides = [1, 1]} : vector<8x512xf32> to vector<8x128xf32>
    %cst_43 = arith.constant 5.000000e-01 : f32
    %118 = vector.broadcast %cst_43 : f32 to vector<8x128xf32>
    %119 = arith.mulf %118, %117 : vector<8x128xf32>
    %120 = math.tanh %119 : vector<8x128xf32>
    %cst_44 = arith.constant 5.000000e-01 : f32
    %121 = vector.broadcast %cst_44 : f32 to vector<8x128xf32>
    %122 = arith.mulf %121, %120 : vector<8x128xf32>
    %cst_45 = arith.constant 5.000000e-01 : f32
    %123 = vector.broadcast %cst_45 : f32 to vector<8x128xf32>
    %124 = arith.addf %122, %123 : vector<8x128xf32>
    %125 = arith.mulf %114, %84 : vector<8x128xf32>
    %126 = arith.mulf %106, %116 : vector<8x128xf32>
    %127 = arith.addf %125, %126 : vector<8x128xf32>
    %128 = math.tanh %127 : vector<8x128xf32>
    %129 = arith.mulf %124, %128 : vector<8x128xf32>
    %130 = arith.truncf %129 : vector<8x128xf32> to vector<8x128xbf16>
    %131 = arith.index_cast %c2_i32 : i32 to index
    %c0_46 = arith.constant 0 : index
    %c0_47 = arith.constant 0 : index
    %132 = vector.load %arg6[%131, %c0_46, %c0_47] : memref<8x8x128xbf16, #tpu.memory_space<vmem>>, vector<1x8x128xbf16>
    %133 = vector.shape_cast %132 : vector<1x8x128xbf16> to vector<8x128xbf16>
    %134 = vector.shape_cast %130 : vector<8x128xbf16> to vector<1x8x128xbf16>
    tpu.vector_store %arg6[%131, %c0_46, %c0_47], %134 {strides = array<i32>} : memref<8x8x128xbf16, #tpu.memory_space<vmem>>, vector<1x8x128xbf16>,
    %c3_i32 = arith.constant 3 : i32
    %135 = arith.truncf %129 : vector<8x128xf32> to vector<8x128xbf16>
    %cst_48 = arith.constant dense<0.000000e+00> : vector<8x512xf32>
    %136 = tpu.matmul %135, %3, %cst_48 {dimension_numbers = #tpu.dot_dimension_numbers<[1], [0], [0], [1], [0, 0, 1, 1], [], []>} : vector<8x128xbf16>, vector<128x512xbf16>, vector<8x512xf32> -> vector<8x512xf32>
    %137 = arith.index_cast %c3_i32 : i32 to index
    %c0_49 = arith.constant 0 : index
    %c0_50 = arith.constant 0 : index
    %138 = vector.load %arg2[%137, %c0_49, %c0_50] : memref<8x8x512xbf16, #tpu.memory_space<vmem>>, vector<1x8x512xbf16>
    %139 = vector.shape_cast %138 : vector<1x8x512xbf16> to vector<8x512xbf16>
    %140 = arith.extf %139 : vector<8x512xbf16> to vector<8x512xf32>
    %141 = arith.addf %136, %140 : vector<8x512xf32>
    %142 = vector.extract_strided_slice %141 {offsets = [0, 0], sizes = [8, 128], strides = [1, 1]} : vector<8x512xf32> to vector<8x128xf32>
    %cst_51 = arith.constant 5.000000e-01 : f32
    %143 = vector.broadcast %cst_51 : f32 to vector<8x128xf32>
    %144 = arith.mulf %143, %142 : vector<8x128xf32>
    %145 = math.tanh %144 : vector<8x128xf32>
    %cst_52 = arith.constant 5.000000e-01 : f32
    %146 = vector.broadcast %cst_52 : f32 to vector<8x128xf32>
    %147 = arith.mulf %146, %145 : vector<8x128xf32>
    %cst_53 = arith.constant 5.000000e-01 : f32
    %148 = vector.broadcast %cst_53 : f32 to vector<8x128xf32>
    %149 = arith.addf %147, %148 : vector<8x128xf32>
    %150 = vector.extract_strided_slice %141 {offsets = [0, 128], sizes = [8, 128], strides = [1, 1]} : vector<8x512xf32> to vector<8x128xf32>
    %cst_54 = arith.constant 5.000000e-01 : f32
    %151 = vector.broadcast %cst_54 : f32 to vector<8x128xf32>
    %152 = arith.mulf %151, %150 : vector<8x128xf32>
    %153 = math.tanh %152 : vector<8x128xf32>
    %cst_55 = arith.constant 5.000000e-01 : f32
    %154 = vector.broadcast %cst_55 : f32 to vector<8x128xf32>
    %155 = arith.mulf %154, %153 : vector<8x128xf32>
    %cst_56 = arith.constant 5.000000e-01 : f32
    %156 = vector.broadcast %cst_56 : f32 to vector<8x128xf32>
    %157 = arith.addf %155, %156 : vector<8x128xf32>
    %158 = vector.extract_strided_slice %141 {offsets = [0, 256], sizes = [8, 128], strides = [1, 1]} : vector<8x512xf32> to vector<8x128xf32>
    %159 = math.tanh %158 : vector<8x128xf32>
    %160 = vector.extract_strided_slice %141 {offsets = [0, 384], sizes = [8, 128], strides = [1, 1]} : vector<8x512xf32> to vector<8x128xf32>
    %cst_57 = arith.constant 5.000000e-01 : f32
    %161 = vector.broadcast %cst_57 : f32 to vector<8x128xf32>
    %162 = arith.mulf %161, %160 : vector<8x128xf32>
    %163 = math.tanh %162 : vector<8x128xf32>
    %cst_58 = arith.constant 5.000000e-01 : f32
    %164 = vector.broadcast %cst_58 : f32 to vector<8x128xf32>
    %165 = arith.mulf %164, %163 : vector<8x128xf32>
    %cst_59 = arith.constant 5.000000e-01 : f32
    %166 = vector.broadcast %cst_59 : f32 to vector<8x128xf32>
    %167 = arith.addf %165, %166 : vector<8x128xf32>
    %168 = arith.mulf %157, %127 : vector<8x128xf32>
    %169 = arith.mulf %149, %159 : vector<8x128xf32>
    %170 = arith.addf %168, %169 : vector<8x128xf32>
    %171 = math.tanh %170 : vector<8x128xf32>
    %172 = arith.mulf %167, %171 : vector<8x128xf32>
    %173 = arith.truncf %172 : vector<8x128xf32> to vector<8x128xbf16>
    %174 = arith.index_cast %c3_i32 : i32 to index
    %c0_60 = arith.constant 0 : index
    %c0_61 = arith.constant 0 : index
    %175 = vector.load %arg6[%174, %c0_60, %c0_61] : memref<8x8x128xbf16, #tpu.memory_space<vmem>>, vector<1x8x128xbf16>
    %176 = vector.shape_cast %175 : vector<1x8x128xbf16> to vector<8x128xbf16>
    %177 = vector.shape_cast %173 : vector<8x128xbf16> to vector<1x8x128xbf16>
    tpu.vector_store %arg6[%174, %c0_60, %c0_61], %177 {strides = array<i32>} : memref<8x8x128xbf16, #tpu.memory_space<vmem>>, vector<1x8x128xbf16>,
    %c4_i32 = arith.constant 4 : i32
    %178 = arith.truncf %172 : vector<8x128xf32> to vector<8x128xbf16>
    %cst_62 = arith.constant dense<0.000000e+00> : vector<8x512xf32>
    %179 = tpu.matmul %178, %3, %cst_62 {dimension_numbers = #tpu.dot_dimension_numbers<[1], [0], [0], [1], [0, 0, 1, 1], [], []>} : vector<8x128xbf16>, vector<128x512xbf16>, vector<8x512xf32> -> vector<8x512xf32>
    %180 = arith.index_cast %c4_i32 : i32 to index
    %c0_63 = arith.constant 0 : index
    %c0_64 = arith.constant 0 : index
    %181 = vector.load %arg2[%180, %c0_63, %c0_64] : memref<8x8x512xbf16, #tpu.memory_space<vmem>>, vector<1x8x512xbf16>
    %182 = vector.shape_cast %181 : vector<1x8x512xbf16> to vector<8x512xbf16>
    %183 = arith.extf %182 : vector<8x512xbf16> to vector<8x512xf32>
    %184 = arith.addf %179, %183 : vector<8x512xf32>
    %185 = vector.extract_strided_slice %184 {offsets = [0, 0], sizes = [8, 128], strides = [1, 1]} : vector<8x512xf32> to vector<8x128xf32>
    %cst_65 = arith.constant 5.000000e-01 : f32
    %186 = vector.broadcast %cst_65 : f32 to vector<8x128xf32>
    %187 = arith.mulf %186, %185 : vector<8x128xf32>
    %188 = math.tanh %187 : vector<8x128xf32>
    %cst_66 = arith.constant 5.000000e-01 : f32
    %189 = vector.broadcast %cst_66 : f32 to vector<8x128xf32>
    %190 = arith.mulf %189, %188 : vector<8x128xf32>
    %cst_67 = arith.constant 5.000000e-01 : f32
    %191 = vector.broadcast %cst_67 : f32 to vector<8x128xf32>
    %192 = arith.addf %190, %191 : vector<8x128xf32>
    %193 = vector.extract_strided_slice %184 {offsets = [0, 128], sizes = [8, 128], strides = [1, 1]} : vector<8x512xf32> to vector<8x128xf32>
    %cst_68 = arith.constant 5.000000e-01 : f32
    %194 = vector.broadcast %cst_68 : f32 to vector<8x128xf32>
    %195 = arith.mulf %194, %193 : vector<8x128xf32>
    %196 = math.tanh %195 : vector<8x128xf32>
    %cst_69 = arith.constant 5.000000e-01 : f32
    %197 = vector.broadcast %cst_69 : f32 to vector<8x128xf32>
    %198 = arith.mulf %197, %196 : vector<8x128xf32>
    %cst_70 = arith.constant 5.000000e-01 : f32
    %199 = vector.broadcast %cst_70 : f32 to vector<8x128xf32>
    %200 = arith.addf %198, %199 : vector<8x128xf32>
    %201 = vector.extract_strided_slice %184 {offsets = [0, 256], sizes = [8, 128], strides = [1, 1]} : vector<8x512xf32> to vector<8x128xf32>
    %202 = math.tanh %201 : vector<8x128xf32>
    %203 = vector.extract_strided_slice %184 {offsets = [0, 384], sizes = [8, 128], strides = [1, 1]} : vector<8x512xf32> to vector<8x128xf32>
    %cst_71 = arith.constant 5.000000e-01 : f32
    %204 = vector.broadcast %cst_71 : f32 to vector<8x128xf32>
    %205 = arith.mulf %204, %203 : vector<8x128xf32>
    %206 = math.tanh %205 : vector<8x128xf32>
    %cst_72 = arith.constant 5.000000e-01 : f32
    %207 = vector.broadcast %cst_72 : f32 to vector<8x128xf32>
    %208 = arith.mulf %207, %206 : vector<8x128xf32>
    %cst_73 = arith.constant 5.000000e-01 : f32
    %209 = vector.broadcast %cst_73 : f32 to vector<8x128xf32>
    %210 = arith.addf %208, %209 : vector<8x128xf32>
    %211 = arith.mulf %200, %170 : vector<8x128xf32>
    %212 = arith.mulf %192, %202 : vector<8x128xf32>
    %213 = arith.addf %211, %212 : vector<8x128xf32>
    %214 = math.tanh %213 : vector<8x128xf32>
    %215 = arith.mulf %210, %214 : vector<8x128xf32>
    %216 = arith.truncf %215 : vector<8x128xf32> to vector<8x128xbf16>
    %217 = arith.index_cast %c4_i32 : i32 to index
    %c0_74 = arith.constant 0 : index
    %c0_75 = arith.constant 0 : index
    %218 = vector.load %arg6[%217, %c0_74, %c0_75] : memref<8x8x128xbf16, #tpu.memory_space<vmem>>, vector<1x8x128xbf16>
    %219 = vector.shape_cast %218 : vector<1x8x128xbf16> to vector<8x128xbf16>
    %220 = vector.shape_cast %216 : vector<8x128xbf16> to vector<1x8x128xbf16>
    tpu.vector_store %arg6[%217, %c0_74, %c0_75], %220 {strides = array<i32>} : memref<8x8x128xbf16, #tpu.memory_space<vmem>>, vector<1x8x128xbf16>,
    %c5_i32 = arith.constant 5 : i32
    %221 = arith.truncf %215 : vector<8x128xf32> to vector<8x128xbf16>
    %cst_76 = arith.constant dense<0.000000e+00> : vector<8x512xf32>
    %222 = tpu.matmul %221, %3, %cst_76 {dimension_numbers = #tpu.dot_dimension_numbers<[1], [0], [0], [1], [0, 0, 1, 1], [], []>} : vector<8x128xbf16>, vector<128x512xbf16>, vector<8x512xf32> -> vector<8x512xf32>
    %223 = arith.index_cast %c5_i32 : i32 to index
    %c0_77 = arith.constant 0 : index
    %c0_78 = arith.constant 0 : index
    %224 = vector.load %arg2[%223, %c0_77, %c0_78] : memref<8x8x512xbf16, #tpu.memory_space<vmem>>, vector<1x8x512xbf16>
    %225 = vector.shape_cast %224 : vector<1x8x512xbf16> to vector<8x512xbf16>
    %226 = arith.extf %225 : vector<8x512xbf16> to vector<8x512xf32>
    %227 = arith.addf %222, %226 : vector<8x512xf32>
    %228 = vector.extract_strided_slice %227 {offsets = [0, 0], sizes = [8, 128], strides = [1, 1]} : vector<8x512xf32> to vector<8x128xf32>
    %cst_79 = arith.constant 5.000000e-01 : f32
    %229 = vector.broadcast %cst_79 : f32 to vector<8x128xf32>
    %230 = arith.mulf %229, %228 : vector<8x128xf32>
    %231 = math.tanh %230 : vector<8x128xf32>
    %cst_80 = arith.constant 5.000000e-01 : f32
    %232 = vector.broadcast %cst_80 : f32 to vector<8x128xf32>
    %233 = arith.mulf %232, %231 : vector<8x128xf32>
    %cst_81 = arith.constant 5.000000e-01 : f32
    %234 = vector.broadcast %cst_81 : f32 to vector<8x128xf32>
    %235 = arith.addf %233, %234 : vector<8x128xf32>
    %236 = vector.extract_strided_slice %227 {offsets = [0, 128], sizes = [8, 128], strides = [1, 1]} : vector<8x512xf32> to vector<8x128xf32>
    %cst_82 = arith.constant 5.000000e-01 : f32
    %237 = vector.broadcast %cst_82 : f32 to vector<8x128xf32>
    %238 = arith.mulf %237, %236 : vector<8x128xf32>
    %239 = math.tanh %238 : vector<8x128xf32>
    %cst_83 = arith.constant 5.000000e-01 : f32
    %240 = vector.broadcast %cst_83 : f32 to vector<8x128xf32>
    %241 = arith.mulf %240, %239 : vector<8x128xf32>
    %cst_84 = arith.constant 5.000000e-01 : f32
    %242 = vector.broadcast %cst_84 : f32 to vector<8x128xf32>
    %243 = arith.addf %241, %242 : vector<8x128xf32>
    %244 = vector.extract_strided_slice %227 {offsets = [0, 256], sizes = [8, 128], strides = [1, 1]} : vector<8x512xf32> to vector<8x128xf32>
    %245 = math.tanh %244 : vector<8x128xf32>
    %246 = vector.extract_strided_slice %227 {offsets = [0, 384], sizes = [8, 128], strides = [1, 1]} : vector<8x512xf32> to vector<8x128xf32>
    %cst_85 = arith.constant 5.000000e-01 : f32
    %247 = vector.broadcast %cst_85 : f32 to vector<8x128xf32>
    %248 = arith.mulf %247, %246 : vector<8x128xf32>
    %249 = math.tanh %248 : vector<8x128xf32>
    %cst_86 = arith.constant 5.000000e-01 : f32
    %250 = vector.broadcast %cst_86 : f32 to vector<8x128xf32>
    %251 = arith.mulf %250, %249 : vector<8x128xf32>
    %cst_87 = arith.constant 5.000000e-01 : f32
    %252 = vector.broadcast %cst_87 : f32 to vector<8x128xf32>
    %253 = arith.addf %251, %252 : vector<8x128xf32>
    %254 = arith.mulf %243, %213 : vector<8x128xf32>
    %255 = arith.mulf %235, %245 : vector<8x128xf32>
    %256 = arith.addf %254, %255 : vector<8x128xf32>
    %257 = math.tanh %256 : vector<8x128xf32>
    %258 = arith.mulf %253, %257 : vector<8x128xf32>
    %259 = arith.truncf %258 : vector<8x128xf32> to vector<8x128xbf16>
    %260 = arith.index_cast %c5_i32 : i32 to index
    %c0_88 = arith.constant 0 : index
    %c0_89 = arith.constant 0 : index
    %261 = vector.load %arg6[%260, %c0_88, %c0_89] : memref<8x8x128xbf16, #tpu.memory_space<vmem>>, vector<1x8x128xbf16>
    %262 = vector.shape_cast %261 : vector<1x8x128xbf16> to vector<8x128xbf16>
    %263 = vector.shape_cast %259 : vector<8x128xbf16> to vector<1x8x128xbf16>
    tpu.vector_store %arg6[%260, %c0_88, %c0_89], %263 {strides = array<i32>} : memref<8x8x128xbf16, #tpu.memory_space<vmem>>, vector<1x8x128xbf16>,
    %c6_i32 = arith.constant 6 : i32
    %264 = arith.truncf %258 : vector<8x128xf32> to vector<8x128xbf16>
    %cst_90 = arith.constant dense<0.000000e+00> : vector<8x512xf32>
    %265 = tpu.matmul %264, %3, %cst_90 {dimension_numbers = #tpu.dot_dimension_numbers<[1], [0], [0], [1], [0, 0, 1, 1], [], []>} : vector<8x128xbf16>, vector<128x512xbf16>, vector<8x512xf32> -> vector<8x512xf32>
    %266 = arith.index_cast %c6_i32 : i32 to index
    %c0_91 = arith.constant 0 : index
    %c0_92 = arith.constant 0 : index
    %267 = vector.load %arg2[%266, %c0_91, %c0_92] : memref<8x8x512xbf16, #tpu.memory_space<vmem>>, vector<1x8x512xbf16>
    %268 = vector.shape_cast %267 : vector<1x8x512xbf16> to vector<8x512xbf16>
    %269 = arith.extf %268 : vector<8x512xbf16> to vector<8x512xf32>
    %270 = arith.addf %265, %269 : vector<8x512xf32>
    %271 = vector.extract_strided_slice %270 {offsets = [0, 0], sizes = [8, 128], strides = [1, 1]} : vector<8x512xf32> to vector<8x128xf32>
    %cst_93 = arith.constant 5.000000e-01 : f32
    %272 = vector.broadcast %cst_93 : f32 to vector<8x128xf32>
    %273 = arith.mulf %272, %271 : vector<8x128xf32>
    %274 = math.tanh %273 : vector<8x128xf32>
    %cst_94 = arith.constant 5.000000e-01 : f32
    %275 = vector.broadcast %cst_94 : f32 to vector<8x128xf32>
    %276 = arith.mulf %275, %274 : vector<8x128xf32>
    %cst_95 = arith.constant 5.000000e-01 : f32
    %277 = vector.broadcast %cst_95 : f32 to vector<8x128xf32>
    %278 = arith.addf %276, %277 : vector<8x128xf32>
    %279 = vector.extract_strided_slice %270 {offsets = [0, 128], sizes = [8, 128], strides = [1, 1]} : vector<8x512xf32> to vector<8x128xf32>
    %cst_96 = arith.constant 5.000000e-01 : f32
    %280 = vector.broadcast %cst_96 : f32 to vector<8x128xf32>
    %281 = arith.mulf %280, %279 : vector<8x128xf32>
    %282 = math.tanh %281 : vector<8x128xf32>
    %cst_97 = arith.constant 5.000000e-01 : f32
    %283 = vector.broadcast %cst_97 : f32 to vector<8x128xf32>
    %284 = arith.mulf %283, %282 : vector<8x128xf32>
    %cst_98 = arith.constant 5.000000e-01 : f32
    %285 = vector.broadcast %cst_98 : f32 to vector<8x128xf32>
    %286 = arith.addf %284, %285 : vector<8x128xf32>
    %287 = vector.extract_strided_slice %270 {offsets = [0, 256], sizes = [8, 128], strides = [1, 1]} : vector<8x512xf32> to vector<8x128xf32>
    %288 = math.tanh %287 : vector<8x128xf32>
    %289 = vector.extract_strided_slice %270 {offsets = [0, 384], sizes = [8, 128], strides = [1, 1]} : vector<8x512xf32> to vector<8x128xf32>
    %cst_99 = arith.constant 5.000000e-01 : f32
    %290 = vector.broadcast %cst_99 : f32 to vector<8x128xf32>
    %291 = arith.mulf %290, %289 : vector<8x128xf32>
    %292 = math.tanh %291 : vector<8x128xf32>
    %cst_100 = arith.constant 5.000000e-01 : f32
    %293 = vector.broadcast %cst_100 : f32 to vector<8x128xf32>
    %294 = arith.mulf %293, %292 : vector<8x128xf32>
    %cst_101 = arith.constant 5.000000e-01 : f32
    %295 = vector.broadcast %cst_101 : f32 to vector<8x128xf32>
    %296 = arith.addf %294, %295 : vector<8x128xf32>
    %297 = arith.mulf %286, %256 : vector<8x128xf32>
    %298 = arith.mulf %278, %288 : vector<8x128xf32>
    %299 = arith.addf %297, %298 : vector<8x128xf32>
    %300 = math.tanh %299 : vector<8x128xf32>
    %301 = arith.mulf %296, %300 : vector<8x128xf32>
    %302 = arith.truncf %301 : vector<8x128xf32> to vector<8x128xbf16>
    %303 = arith.index_cast %c6_i32 : i32 to index
    %c0_102 = arith.constant 0 : index
    %c0_103 = arith.constant 0 : index
    %304 = vector.load %arg6[%303, %c0_102, %c0_103] : memref<8x8x128xbf16, #tpu.memory_space<vmem>>, vector<1x8x128xbf16>
    %305 = vector.shape_cast %304 : vector<1x8x128xbf16> to vector<8x128xbf16>
    %306 = vector.shape_cast %302 : vector<8x128xbf16> to vector<1x8x128xbf16>
    tpu.vector_store %arg6[%303, %c0_102, %c0_103], %306 {strides = array<i32>} : memref<8x8x128xbf16, #tpu.memory_space<vmem>>, vector<1x8x128xbf16>,
    %c7_i32 = arith.constant 7 : i32
    %307 = arith.truncf %301 : vector<8x128xf32> to vector<8x128xbf16>
    %cst_104 = arith.constant dense<0.000000e+00> : vector<8x512xf32>
    %308 = tpu.matmul %307, %3, %cst_104 {dimension_numbers = #tpu.dot_dimension_numbers<[1], [0], [0], [1], [0, 0, 1, 1], [], []>} : vector<8x128xbf16>, vector<128x512xbf16>, vector<8x512xf32> -> vector<8x512xf32>
    %309 = arith.index_cast %c7_i32 : i32 to index
    %c0_105 = arith.constant 0 : index
    %c0_106 = arith.constant 0 : index
    %310 = vector.load %arg2[%309, %c0_105, %c0_106] : memref<8x8x512xbf16, #tpu.memory_space<vmem>>, vector<1x8x512xbf16>
    %311 = vector.shape_cast %310 : vector<1x8x512xbf16> to vector<8x512xbf16>
    %312 = arith.extf %311 : vector<8x512xbf16> to vector<8x512xf32>
    %313 = arith.addf %308, %312 : vector<8x512xf32>
    %314 = vector.extract_strided_slice %313 {offsets = [0, 0], sizes = [8, 128], strides = [1, 1]} : vector<8x512xf32> to vector<8x128xf32>
    %cst_107 = arith.constant 5.000000e-01 : f32
    %315 = vector.broadcast %cst_107 : f32 to vector<8x128xf32>
    %316 = arith.mulf %315, %314 : vector<8x128xf32>
    %317 = math.tanh %316 : vector<8x128xf32>
    %cst_108 = arith.constant 5.000000e-01 : f32
    %318 = vector.broadcast %cst_108 : f32 to vector<8x128xf32>
    %319 = arith.mulf %318, %317 : vector<8x128xf32>
    %cst_109 = arith.constant 5.000000e-01 : f32
    %320 = vector.broadcast %cst_109 : f32 to vector<8x128xf32>
    %321 = arith.addf %319, %320 : vector<8x128xf32>
    %322 = vector.extract_strided_slice %313 {offsets = [0, 128], sizes = [8, 128], strides = [1, 1]} : vector<8x512xf32> to vector<8x128xf32>
    %cst_110 = arith.constant 5.000000e-01 : f32
    %323 = vector.broadcast %cst_110 : f32 to vector<8x128xf32>
    %324 = arith.mulf %323, %322 : vector<8x128xf32>
    %325 = math.tanh %324 : vector<8x128xf32>
    %cst_111 = arith.constant 5.000000e-01 : f32
    %326 = vector.broadcast %cst_111 : f32 to vector<8x128xf32>
    %327 = arith.mulf %326, %325 : vector<8x128xf32>
    %cst_112 = arith.constant 5.000000e-01 : f32
    %328 = vector.broadcast %cst_112 : f32 to vector<8x128xf32>
    %329 = arith.addf %327, %328 : vector<8x128xf32>
    %330 = vector.extract_strided_slice %313 {offsets = [0, 256], sizes = [8, 128], strides = [1, 1]} : vector<8x512xf32> to vector<8x128xf32>
    %331 = math.tanh %330 : vector<8x128xf32>
    %332 = vector.extract_strided_slice %313 {offsets = [0, 384], sizes = [8, 128], strides = [1, 1]} : vector<8x512xf32> to vector<8x128xf32>
    %cst_113 = arith.constant 5.000000e-01 : f32
    %333 = vector.broadcast %cst_113 : f32 to vector<8x128xf32>
    %334 = arith.mulf %333, %332 : vector<8x128xf32>
    %335 = math.tanh %334 : vector<8x128xf32>
    %cst_114 = arith.constant 5.000000e-01 : f32
    %336 = vector.broadcast %cst_114 : f32 to vector<8x128xf32>
    %337 = arith.mulf %336, %335 : vector<8x128xf32>
    %cst_115 = arith.constant 5.000000e-01 : f32
    %338 = vector.broadcast %cst_115 : f32 to vector<8x128xf32>
    %339 = arith.addf %337, %338 : vector<8x128xf32>
    %340 = arith.mulf %329, %299 : vector<8x128xf32>
    %341 = arith.mulf %321, %331 : vector<8x128xf32>
    %342 = arith.addf %340, %341 : vector<8x128xf32>
    %343 = math.tanh %342 : vector<8x128xf32>
    %344 = arith.mulf %339, %343 : vector<8x128xf32>
    %345 = arith.truncf %344 : vector<8x128xf32> to vector<8x128xbf16>
    %346 = arith.index_cast %c7_i32 : i32 to index
    %c0_116 = arith.constant 0 : index
    %c0_117 = arith.constant 0 : index
    %347 = vector.load %arg6[%346, %c0_116, %c0_117] : memref<8x8x128xbf16, #tpu.memory_space<vmem>>, vector<1x8x128xbf16>
    %348 = vector.shape_cast %347 : vector<1x8x128xbf16> to vector<8x128xbf16>
    %349 = vector.shape_cast %345 : vector<8x128xbf16> to vector<1x8x128xbf16>
    tpu.vector_store %arg6[%346, %c0_116, %c0_117], %349 {strides = array<i32>} : memref<8x8x128xbf16, #tpu.memory_space<vmem>>, vector<1x8x128xbf16>,
    %c8_i32 = arith.constant 8 : i32
    %c0_118 = arith.constant 0 : index
    %c0_119 = arith.constant 0 : index
    %350 = vector.load %arg7[%c0_118, %c0_119] : memref<8x128xf32, #tpu.memory_space<vmem>>, vector<8x128xf32>
    tpu.vector_store %arg7[%c0_118, %c0_119], %344 {strides = array<i32>} : memref<8x128xf32, #tpu.memory_space<vmem>>, vector<8x128xf32>,
    %c0_120 = arith.constant 0 : index
    %c0_121 = arith.constant 0 : index
    %351 = vector.load %arg8[%c0_120, %c0_121] : memref<8x128xf32, #tpu.memory_space<vmem>>, vector<8x128xf32>
    tpu.vector_store %arg8[%c0_120, %c0_121], %342 {strides = array<i32>} : memref<8x128xf32, #tpu.memory_space<vmem>>, vector<8x128xf32>,
    return
  }
  func.func @transform_0(%arg0: i32, %arg1: i32) -> (i32, i32, i32) {
    %c0_i32 = arith.constant 0 : i32
    %c0_i32_0 = arith.constant 0 : i32
    return %arg1, %arg0, %c0_i32 : i32, i32, i32
  }
  func.func @transform_1(%arg0: i32, %arg1: i32) -> (i32, i32) {
    %c0_i32 = arith.constant 0 : i32
    %c0_i32_0 = arith.constant 0 : i32
    %c0_i32_1 = arith.constant 0 : i32
    return %c0_i32, %c0_i32_0 : i32, i32
  }
  func.func @transform_2(%arg0: i32, %arg1: i32) -> (i32, i32) {
    %c0_i32 = arith.constant 0 : i32
    %c0_i32_0 = arith.constant 0 : i32
    return %arg0, %c0_i32 : i32, i32
  }
  func.func @transform_3(%arg0: i32, %arg1: i32) -> (i32, i32) {
    %c0_i32 = arith.constant 0 : i32
    %c0_i32_0 = arith.constant 0 : i32
    return %arg0, %c0_i32 : i32, i32
  }
  func.func @transform_4(%arg0: i32, %arg1: i32) -> (i32, i32, i32) {
    %c0_i32 = arith.constant 0 : i32
    %c0_i32_0 = arith.constant 0 : i32
    return %arg1, %arg0, %c0_i32 : i32, i32, i32
  }
  func.func @transform_5(%arg0: i32, %arg1: i32) -> (i32, i32) {
    %c0_i32 = arith.constant 0 : i32
    %c0_i32_0 = arith.constant 0 : i32
    return %arg0, %c0_i32 : i32, i32
  }
  func.func @transform_6(%arg0: i32, %arg1: i32) -> (i32, i32) {
    %c0_i32 = arith.constant 0 : i32
    %c0_i32_0 = arith.constant 0 : i32
    return %arg0, %c0_i32 : i32, i32
  }
}

</mosaic_0001>

<bundles_post_ra>
// kernel: rnn_model_forward.2
= control target key start
LH: loop header
LB: loop body
LE: loop exit
PB: predicated region body
PF: predicated region fallthrough
CT: control target
= control target key end

     0   :  { %v1330_v1 = vmov 0   ;;  %s1970_s1 = inlined_call_operand.vmem [shape: bf16[128,512], index: 1, kind: input, shape index: {}]   ;;  %s1971_s2 = inlined_call_operand.vmem [shape: f32[8,128], index: 2, kind: input, shape index: {}]   ;;  %s1972_s0 = inlined_call_operand.vmem [shape: bf16[8,8,512], index: 0, kind: input, shape index: {}]   ;;  %s1973_s3 = inlined_call_operand.vmem [shape: f32[8,128], index: 3, kind: input, shape index: {}]   ;;  %s1974_s4 = inlined_call_operand.vmem [shape: bf16[8,8,128], index: 4, kind: output, shape index: {0}]   ;;  %s1975_s6 = inlined_call_operand.vmem [shape: f32[8,128], index: 6, kind: output, shape index: {2}]   ;;  %s1976_s5 = inlined_call_operand.vmem [shape: f32[8,128], index: 5, kind: output, shape index: {1}]  }
   0x1   :  { %v1369_v0 = vld [vmem:[%s1970_s1 + $0xe4] ss:$16 sps:$4 sm:$0xff]   ;;  %262 = vmatprep.mubr.bf16.mxu0 %v1330_v1  ;;  %303 = vmatprep.mubr.bf16.mxu1 %v1330_v1  ;;  %v1376_v2 = vld [vmem:[%s1970_s1 + $0xe0] ss:$16 sps:$4 sm:$0xff]   ;;  %v1382_v3 = vld [vmem:[%s1970_s1 + $0xec] ss:$16 sps:$4 sm:$0xff]  }
   0x2   :  { %230 = vmatprep.subr.bf16.mxu0 %v1369_v0  ;;  %v1387_v4 = vld [vmem:[%s1970_s1 + $0xe8] ss:$16 sps:$4 sm:$0xff]   ;;  %v1393_v5 = vld [vmem:[%s1970_s1 + $0xc4] ss:$16 sps:$4 sm:$0xff]   ;;  %v1398_v6 = vld [vmem:[%s1970_s1 + $0xc0] ss:$16 sps:$4 sm:$0xff]   ;;  %271 = vmatprep.subr.bf16.mxu1 %v1382_v3 }
   0x3   :  { %231 = vmatpush1.bf16.msra.mxu0 %v1376_v2  ;;  %v1404_v7 = vld [vmem:[%s1970_s1 + $0xcc] ss:$16 sps:$4 sm:$0xff]   ;;  %272 = vmatpush1.bf16.msra.mxu1 %v1387_v4  ;;  %v1411_v8 = vld [vmem:[%s1970_s1 + $0xc8] ss:$16 sps:$4 sm:$0xff]   ;;  %v1417_v9 = vld [vmem:[%s1970_s1 + $0xa4] ss:$16 sps:$4 sm:$0xff]  }
   0x4   :  { %232 = vmatprep.subr.bf16.mxu0 %v1393_v5  ;;  %273 = vmatprep.subr.bf16.mxu1 %v1404_v7  ;;  %v1423_v10 = vld [vmem:[%s1970_s1 + $0xa0] ss:$16 sps:$4 sm:$0xff]   ;;  %v1428_v11 = vld [vmem:[%s1970_s1 + $0xac] ss:$16 sps:$4 sm:$0xff]   ;;  %v1434_v12 = vld [vmem:[%s1970_s1 + $0x84] ss:$16 sps:$4 sm:$0xff]  }
   0x5   :  { %v1440_v13 = vld [vmem:[%s1970_s1 + $0xa8] ss:$16 sps:$4 sm:$0xff]   ;;  %v1446_v14 = vld [vmem:[%s1970_s1 + $0x8c] ss:$16 sps:$4 sm:$0xff]   ;;  %v1452_v15 = vld [vmem:[%s1970_s1 + $0x80] ss:$16 sps:$4 sm:$0xff]  }
   0x6   :  { %v1458_v16 = vld [vmem:[%s1970_s1 + $0x64] ss:$16 sps:$4 sm:$0xff]   ;;  %v1464_v17 = vld [vmem:[%s1970_s1 + $0x88] ss:$16 sps:$4 sm:$0xff]   ;;  %v1470_v18 = vld [vmem:[%s1970_s1 + $0x6c] ss:$16 sps:$4 sm:$0xff]  }
   0x7   :  { %233 = vmatpush1.bf16.msra.mxu0 %v1398_v6  ;;  %274 = vmatpush1.bf16.msra.mxu1 %v1411_v8  ;;  %v1476_v19 = vld [vmem:[%s1970_s1 + $0x60] ss:$16 sps:$4 sm:$0xff]   ;;  %v1482_v20 = vld [vmem:[%s1970_s1 + $0x44] ss:$16 sps:$4 sm:$0xff]   ;;  %v1488_v21 = vld [vmem:[%s1970_s1 + $0x68] ss:$16 sps:$4 sm:$0xff]  }
   0x8   :  { %234 = vmatprep.subr.bf16.mxu0 %v1417_v9  ;;  %275 = vmatprep.subr.bf16.mxu1 %v1428_v11  ;;  %v1494_v22 = vld [vmem:[%s1970_s1 + $0x4c] ss:$16 sps:$4 sm:$0xff]   ;;  %v1500_v23 = vld [vmem:[%s1970_s1 + $0x40] ss:$16 sps:$4 sm:$0xff]   ;;  %v1506_v24 = vld [vmem:[%s1970_s1 + $0x24] ss:$16 sps:$4 sm:$0xff]  }
   0x9   :  { %v1512_v25 = vld [vmem:[%s1970_s1 + $0x48] ss:$16 sps:$4 sm:$0xff]   ;;  %v1518_v26 = vld [vmem:[%s1970_s1 + $0x2c] ss:$16 sps:$4 sm:$0xff]   ;;  %v1524_v27 = vld [vmem:[%s1970_s1 + $0x20] ss:$16 sps:$4 sm:$0xff]  }
   0xa   :  { %v1530_v28 = vld [vmem:[%s1970_s1 + $0x4] ss:$16 sps:$4 sm:$0xff]   ;;  %v1536_v29 = vld [vmem:[%s1970_s1 + $0x28] ss:$16 sps:$4 sm:$0xff]   ;;  %v1542_v30 = vld [vmem:[%s1970_s1 + $0xc] ss:$16 sps:$4 sm:$0xff]  }
   0xb   :  { %235 = vmatpush1.bf16.msra.mxu0 %v1423_v10  ;;  %276 = vmatpush1.bf16.msra.mxu1 %v1440_v13  ;;  %v1548_v31 = vld [vmem:[%s1970_s1] ss:$16 sps:$4 sm:$0xff]   ;;  %v1558_v33 = vld [vmem:[%s1970_s1 + $0x8] ss:$16 sps:$4 sm:$0xff]  }
   0xc   :  { %236 = vmatprep.subr.bf16.mxu0 %v1434_v12  ;;  %277 = vmatprep.subr.bf16.mxu1 %v1446_v14  ;;  %v25_v32 = vld [vmem:[%s1971_s2] sm:$0xff]  ;;  %v65_v37 = vld [vmem:[%s1972_s0 + $0x8] sm:$0xff] }
   0xd   :  { %v63_v34 = vpack.c.bf16 %v25_v32, %v25_v32  ;;  %v64_v35 = vld [vmem:[%s1972_s0] sm:$0xff]  ;;  %v68_v41 = vunpack.c.l.bf16 %v65_v37  ;;  %v69_v53 = vunpack.c.h.bf16 %v65_v37 }
   0xe   :  { %v66_v36 = vunpack.c.l.bf16 %v64_v35  ;;  %v67_v38 = vunpack.c.h.bf16 %v64_v35  ;;  %v27_v62 = vld [vmem:[%s1973_s3] sm:$0xff] }
   0xf   :  { %237 = vmatpush1.bf16.msra.mxu0 %v1452_v15  ;;  %278 = vmatpush1.bf16.msra.mxu1 %v1464_v17 }
  0x10   :  { %238 = vmatprep.subr.bf16.mxu0 %v1458_v16  ;;  %279 = vmatprep.subr.bf16.mxu1 %v1470_v18 }
  0x13   :  { %239 = vmatpush1.bf16.msra.mxu0 %v1476_v19  ;;  %280 = vmatpush1.bf16.msra.mxu1 %v1488_v21 }
  0x14   :  { %240 = vmatprep.subr.bf16.mxu0 %v1482_v20  ;;  %281 = vmatprep.subr.bf16.mxu1 %v1494_v22 }
  0x17   :  { %241 = vmatpush1.bf16.msra.mxu0 %v1500_v23  ;;  %282 = vmatpush1.bf16.msra.mxu1 %v1512_v25 }
  0x18   :  { %242 = vmatprep.subr.bf16.mxu0 %v1506_v24  ;;  %283 = vmatprep.subr.bf16.mxu1 %v1518_v26 }
  0x1b   :  { %243 = vmatpush1.bf16.msra.mxu0 %v1524_v27  ;;  %284 = vmatpush1.bf16.msra.mxu1 %v1536_v29 }
  0x1c   :  { %244 = vmatprep.subr.bf16.mxu0 %v1530_v28  ;;  %285 = vmatprep.subr.bf16.mxu1 %v1542_v30 }
  0x1f   :  { %245 = vmatpush1.bf16.msra.mxu0 %v1548_v31  ;;  %286 = vmatpush1.bf16.msra.mxu1 %v1558_v33 }
  0x20   :  { %339 = vmatprep.subr.bf16.mxu0 %v1369_v0  ;;  %380 = vmatprep.subr.bf16.mxu1 %v1382_v3 }
  0x22   :  { %263 = vmatmul.mubr.bf16.vlgmr.msra.gmra.mxu0 %v63_v34  ;;  %304 = vmatmul.mubr.bf16.vlgmr.msra.gmra.mxu1 %v63_v34 }
  0x23   :  { %340 = vmatpush1.bf16.msra.mxu0 %v1376_v2  ;;  %371 = vmatprep.mubr.bf16.mxu0 %v1330_v1 }
  0x24   :  { %341 = vmatprep.subr.bf16.mxu0 %v1393_v5  ;;  %381 = vmatpush1.bf16.msra.mxu1 %v1387_v4 }
  0x25   :  { %412 = vmatprep.mubr.bf16.mxu1 %v1330_v1  ;;  %382 = vmatprep.subr.bf16.mxu1 %v1404_v7 }
  0x27   :  { %342 = vmatpush1.bf16.msra.mxu0 %v1398_v6 }
  0x28   :  { %343 = vmatprep.subr.bf16.mxu0 %v1417_v9  ;;  %383 = vmatpush1.bf16.msra.mxu1 %v1411_v8 }
  0x29   :  { %384 = vmatprep.subr.bf16.mxu1 %v1428_v11 }
  0x2b   :  { %344 = vmatpush1.bf16.msra.mxu0 %v1423_v10 }
  0x2c   :  { %345 = vmatprep.subr.bf16.mxu0 %v1434_v12  ;;  %385 = vmatpush1.bf16.msra.mxu1 %v1440_v13 }
  0x2d   :  { %386 = vmatprep.subr.bf16.mxu1 %v1446_v14 }
  0x2f   :  { %346 = vmatpush1.bf16.msra.mxu0 %v1452_v15 }
  0x30   :  { %347 = vmatprep.subr.bf16.mxu0 %v1458_v16  ;;  %387 = vmatpush1.bf16.msra.mxu1 %v1464_v17 }
  0x31   :  { %388 = vmatprep.subr.bf16.mxu1 %v1470_v18 }
  0x33   :  { %348 = vmatpush1.bf16.msra.mxu0 %v1476_v19 }
  0x34   :  { %349 = vmatprep.subr.bf16.mxu0 %v1482_v20  ;;  %389 = vmatpush1.bf16.msra.mxu1 %v1488_v21 }
  0x35   :  { %390 = vmatprep.subr.bf16.mxu1 %v1494_v22 }
  0x37   :  { %350 = vmatpush1.bf16.msra.mxu0 %v1500_v23 }
  0x38   :  { %351 = vmatprep.subr.bf16.mxu0 %v1506_v24  ;;  %391 = vmatpush1.bf16.msra.mxu1 %v1512_v25 }
  0x39   :  { %392 = vmatprep.subr.bf16.mxu1 %v1518_v26 }
  0x3b   :  { %352 = vmatpush1.bf16.msra.mxu0 %v1524_v27 }
  0x3c   :  { %353 = vmatprep.subr.bf16.mxu0 %v1530_v28  ;;  %393 = vmatpush1.bf16.msra.mxu1 %v1536_v29 }
  0x3d   :  { %394 = vmatprep.subr.bf16.mxu1 %v1542_v30 }
  0x3f   :  { %354 = vmatpush1.bf16.msra.mxu0 %v1548_v31 }
  0x40   :  { %449 = vmatprep.subr.bf16.mxu0 %v1369_v0  ;;  %395 = vmatpush1.bf16.msra.mxu1 %v1558_v33 }
  0x41   :  { %490 = vmatprep.subr.bf16.mxu1 %v1382_v3 }
  0xe2   :  { %v264_v39 = vpop.f32.mrf.mxu0  ;;  %v305_v43 = vpop.f32.mrf.mxu1 }
  0xe3   :  { %v265_v40 = vadd.f32 %v264_v39, %v66_v36  ;;  %v306_v49 = vadd.f32 %v305_v43, %v68_v41 }
  0xe4   :  { %v266_v42 = vpop.f32.mrf.mxu0  ;;  %v307_v47 = vpop.f32.mrf.mxu1 }
  0xe5   :  { %v312_v44 = vmul.f32 0.5, %v265_v40  ;;  %v267_v45 = vadd.f32 %v266_v42, %v67_v38  ;;  %v308_v54 = vadd.f32 %v307_v47, %v69_v53  ;;  %v1148_v42 = vld [vmem:[%s1972_s0 + $0x10] sm:$0xff] }
  0xe6   :  { %v268_v46 = vpop.f32.mrf.mxu0  ;;  %v309_v51 = vpop.f32.mrf.mxu1  ;;  %v335_v43 = vunpack.c.l.bf16 %v1148_v42 }
  0xe7   :  { %1218 = vtanh.f32 %v312_v44  ;;  %v316_v48 = vmul.f32 0.5, %v267_v45  ;;  %v321_v55 = vmul.f32 0.5, %v308_v54  ;;  %v336_v44 = vunpack.c.h.bf16 %v1148_v42  ;;  %v1149_v46 = vld [vmem:[%s1972_s0 + $0x18] sm:$0xff] }
  0xe8   :  { %v269_v50 = vpop.f32.mrf.mxu0  ;;  %v310_v52 = vpop.f32.mrf.mxu1 }
  0xe9   :  { %1220 = vtanh.f32 %v316_v48  ;;  %v337_v52 = vunpack.c.l.bf16 %v1149_v46 }
  0xea   :  { %1222 = vtanh.f32 %v306_v49 }
  0xeb   :  { %1224 = vtanh.f32 %v321_v55 }
  0xf4   :  { %v1219_v56 = vpop.eup %1218 }
  0xf5   :  { %v314_v57 = vmul.f32 0.5, %v1219_v56 }
  0xf6   :  { %v1221_v58 = vpop.eup %1220 }
  0xf7   :  { %v315_v59 = vadd.f32 0.5, %v314_v57  ;;  %v318_v60 = vmul.f32 0.5, %v1221_v58  ;;  %v1223_v61 = vpop.eup %1222 }
  0xf8   :  { %v1225_v36 = vpop.eup %1224 }
  0xf9   :  { %v319_v63 = vadd.f32 0.5, %v318_v60  ;;  %v326_v34 = vmul.f32 %v1223_v61, %v315_v59  ;;  %v323_v37 = vmul.f32 0.5, %v1225_v36  ;;  %v338_v60 = vunpack.c.h.bf16 %v1149_v46 }
  0xfb   :  { %v325_v32 = vmul.f32 %v319_v63, %v27_v62  ;;  %v324_v38 = vadd.f32 0.5, %v323_v37 }
  0xfd   :  { %v1608_v35 = vadd.f32 %v326_v34, %v325_v32 }
  0xff   :  { %1226 = vtanh.f32 %v1608_v35 }
 0x10c   :  { %v1227_v39 = vpop.eup %1226 }
 0x10d   :  { %v329_v40 = vmul.f32 %v1227_v39, %v324_v38 }
 0x10f   :  { %v330_v41 = vpack.c.bf16 %v329_v40, %v329_v40 }
 0x111   :  { %331 = vst [vmem:[%s1974_s4] sm:$0xf] %v330_v41  ;;  %372 = vmatmul.mubr.bf16.vlgmr.msra.gmra.mxu0 %v330_v41  ;;  %413 = vmatmul.mubr.bf16.vlgmr.msra.gmra.mxu1 %v330_v41 }
 0x112   :  { %450 = vmatpush1.bf16.msra.mxu0 %v1376_v2  ;;  %491 = vmatpush1.bf16.msra.mxu1 %v1387_v4 }
 0x113   :  { %451 = vmatprep.subr.bf16.mxu0 %v1393_v5  ;;  %492 = vmatprep.subr.bf16.mxu1 %v1404_v7 }
 0x114   :  { %481 = vmatprep.mubr.bf16.mxu0 %v1330_v1  ;;  %522 = vmatprep.mubr.bf16.mxu1 %v1330_v1 }
 0x116   :  { %452 = vmatpush1.bf16.msra.mxu0 %v1398_v6  ;;  %493 = vmatpush1.bf16.msra.mxu1 %v1411_v8 }
 0x117   :  { %453 = vmatprep.subr.bf16.mxu0 %v1417_v9  ;;  %494 = vmatprep.subr.bf16.mxu1 %v1428_v11 }
 0x11a   :  { %454 = vmatpush1.bf16.msra.mxu0 %v1423_v10  ;;  %495 = vmatpush1.bf16.msra.mxu1 %v1440_v13 }
 0x11b   :  { %455 = vmatprep.subr.bf16.mxu0 %v1434_v12  ;;  %496 = vmatprep.subr.bf16.mxu1 %v1446_v14 }
 0x11e   :  { %456 = vmatpush1.bf16.msra.mxu0 %v1452_v15  ;;  %497 = vmatpush1.bf16.msra.mxu1 %v1464_v17 }
 0x11f   :  { %457 = vmatprep.subr.bf16.mxu0 %v1458_v16  ;;  %498 = vmatprep.subr.bf16.mxu1 %v1470_v18 }
 0x122   :  { %458 = vmatpush1.bf16.msra.mxu0 %v1476_v19  ;;  %499 = vmatpush1.bf16.msra.mxu1 %v1488_v21 }
 0x123   :  { %459 = vmatprep.subr.bf16.mxu0 %v1482_v20  ;;  %500 = vmatprep.subr.bf16.mxu1 %v1494_v22 }
 0x126   :  { %460 = vmatpush1.bf16.msra.mxu0 %v1500_v23  ;;  %501 = vmatpush1.bf16.msra.mxu1 %v1512_v25 }
 0x127   :  { %461 = vmatprep.subr.bf16.mxu0 %v1506_v24  ;;  %502 = vmatprep.subr.bf16.mxu1 %v1518_v26 }
 0x12a   :  { %462 = vmatpush1.bf16.msra.mxu0 %v1524_v27  ;;  %503 = vmatpush1.bf16.msra.mxu1 %v1536_v29 }
 0x12b   :  { %463 = vmatprep.subr.bf16.mxu0 %v1530_v28  ;;  %504 = vmatprep.subr.bf16.mxu1 %v1542_v30 }
 0x12e   :  { %464 = vmatpush1.bf16.msra.mxu0 %v1548_v31  ;;  %505 = vmatpush1.bf16.msra.mxu1 %v1558_v33 }
 0x12f   :  { %559 = vmatprep.subr.bf16.mxu0 %v1369_v0  ;;  %600 = vmatprep.subr.bf16.mxu1 %v1382_v3 }
 0x1d1   :  { %v373_v45 = vpop.f32.mrf.mxu0  ;;  %v414_v47 = vpop.f32.mrf.mxu1 }
 0x1d2   :  { %v374_v48 = vadd.f32 %v373_v45, %v335_v43  ;;  %v415_v59 = vadd.f32 %v414_v47, %v337_v52  ;;  %v1152_v52 = vld [vmem:[%s1972_s0 + $0x28] sm:$0xff] }
 0x1d3   :  { %v375_v49 = vpop.f32.mrf.mxu0  ;;  %v416_v50 = vpop.f32.mrf.mxu1 }
 0x1d4   :  { %v421_v51 = vmul.f32 0.5, %v374_v48  ;;  %v376_v53 = vadd.f32 %v375_v49, %v336_v44  ;;  %v417_v61 = vadd.f32 %v416_v50, %v338_v60 }
 0x1d5   :  { %v377_v54 = vpop.f32.mrf.mxu0  ;;  %v418_v55 = vpop.f32.mrf.mxu1 }
 0x1d6   :  { %1228 = vtanh.f32 %v421_v51  ;;  %v425_v56 = vmul.f32 0.5, %v376_v53  ;;  %v430_v62 = vmul.f32 0.5, %v417_v61 }
 0x1d7   :  { %v378_v57 = vpop.f32.mrf.mxu0  ;;  %v419_v58 = vpop.f32.mrf.mxu1 }
 0x1d8   :  { %1230 = vtanh.f32 %v425_v56  ;;  %v447_v58 = vunpack.c.l.bf16 %v1152_v52 }
 0x1d9   :  { %1232 = vtanh.f32 %v415_v59 }
 0x1da   :  { %1234 = vtanh.f32 %v430_v62 }
 0x1e3   :  { %v1229_v63 = vpop.eup %1228 }
 0x1e4   :  { %v423_v32 = vmul.f32 0.5, %v1229_v63 }
 0x1e5   :  { %v1231_v34 = vpop.eup %1230 }
 0x1e6   :  { %v424_v36 = vadd.f32 0.5, %v423_v32  ;;  %v427_v37 = vmul.f32 0.5, %v1231_v34  ;;  %v1233_v39 = vpop.eup %1232 }
 0x1e7   :  { %v1235_v43 = vpop.eup %1234 }
 0x1e8   :  { %v428_v38 = vadd.f32 0.5, %v427_v37  ;;  %v435_v41 = vmul.f32 %v1233_v39, %v424_v36  ;;  %v432_v44 = vmul.f32 0.5, %v1235_v43  ;;  %v448_v36 = vunpack.c.h.bf16 %v1152_v52 }
 0x1ea   :  { %v434_v40 = vmul.f32 %v428_v38, %v1608_v35  ;;  %v433_v45 = vadd.f32 0.5, %v432_v44  ;;  %v1151_v35 = vld [vmem:[%s1972_s0 + $0x20] sm:$0xff] }
 0x1eb   :  { %v445_v49 = vunpack.c.l.bf16 %v1151_v35  ;;  %v446_v50 = vunpack.c.h.bf16 %v1151_v35 }
 0x1ec   :  { %v1655_v42 = vadd.f32 %v435_v41, %v434_v40 }
 0x1ee   :  { %1236 = vtanh.f32 %v1655_v42 }
 0x1fb   :  { %v1237_v46 = vpop.eup %1236 }
 0x1fc   :  { %v438_v47 = vmul.f32 %v1237_v46, %v433_v45 }
 0x1fe   :  { %v439_v48 = vpack.c.bf16 %v438_v47, %v438_v47 }
 0x200   :  { %1150 = vst [vmem:[%s1974_s4 + $0x4] sm:$0xf] %v439_v48  ;;  %482 = vmatmul.mubr.bf16.vlgmr.msra.gmra.mxu0 %v439_v48  ;;  %523 = vmatmul.mubr.bf16.vlgmr.msra.gmra.mxu1 %v439_v48 }
 0x201   :  { %560 = vmatpush1.bf16.msra.mxu0 %v1376_v2  ;;  %601 = vmatpush1.bf16.msra.mxu1 %v1387_v4 }
 0x202   :  { %561 = vmatprep.subr.bf16.mxu0 %v1393_v5  ;;  %602 = vmatprep.subr.bf16.mxu1 %v1404_v7 }
 0x203   :  { %591 = vmatprep.mubr.bf16.mxu0 %v1330_v1  ;;  %632 = vmatprep.mubr.bf16.mxu1 %v1330_v1 }
 0x205   :  { %562 = vmatpush1.bf16.msra.mxu0 %v1398_v6  ;;  %603 = vmatpush1.bf16.msra.mxu1 %v1411_v8 }
 0x206   :  { %563 = vmatprep.subr.bf16.mxu0 %v1417_v9  ;;  %604 = vmatprep.subr.bf16.mxu1 %v1428_v11 }
 0x209   :  { %564 = vmatpush1.bf16.msra.mxu0 %v1423_v10  ;;  %605 = vmatpush1.bf16.msra.mxu1 %v1440_v13 }
 0x20a   :  { %565 = vmatprep.subr.bf16.mxu0 %v1434_v12  ;;  %606 = vmatprep.subr.bf16.mxu1 %v1446_v14 }
 0x20d   :  { %566 = vmatpush1.bf16.msra.mxu0 %v1452_v15  ;;  %607 = vmatpush1.bf16.msra.mxu1 %v1464_v17 }
 0x20e   :  { %567 = vmatprep.subr.bf16.mxu0 %v1458_v16  ;;  %608 = vmatprep.subr.bf16.mxu1 %v1470_v18 }
 0x211   :  { %568 = vmatpush1.bf16.msra.mxu0 %v1476_v19  ;;  %609 = vmatpush1.bf16.msra.mxu1 %v1488_v21 }
 0x212   :  { %569 = vmatprep.subr.bf16.mxu0 %v1482_v20  ;;  %610 = vmatprep.subr.bf16.mxu1 %v1494_v22 }
 0x215   :  { %570 = vmatpush1.bf16.msra.mxu0 %v1500_v23  ;;  %611 = vmatpush1.bf16.msra.mxu1 %v1512_v25 }
 0x216   :  { %571 = vmatprep.subr.bf16.mxu0 %v1506_v24  ;;  %612 = vmatprep.subr.bf16.mxu1 %v1518_v26 }
 0x219   :  { %572 = vmatpush1.bf16.msra.mxu0 %v1524_v27  ;;  %613 = vmatpush1.bf16.msra.mxu1 %v1536_v29 }
 0x21a   :  { %573 = vmatprep.subr.bf16.mxu0 %v1530_v28  ;;  %614 = vmatprep.subr.bf16.mxu1 %v1542_v30 }
 0x21d   :  { %574 = vmatpush1.bf16.msra.mxu0 %v1548_v31  ;;  %615 = vmatpush1.bf16.msra.mxu1 %v1558_v33 }
 0x21e   :  { %669 = vmatprep.subr.bf16.mxu0 %v1369_v0  ;;  %710 = vmatprep.subr.bf16.mxu1 %v1382_v3 }
 0x2c0   :  { %v483_v51 = vpop.f32.mrf.mxu0  ;;  %v524_v53 = vpop.f32.mrf.mxu1 }
 0x2c1   :  { %v484_v54 = vadd.f32 %v483_v51, %v445_v49  ;;  %v525_v34 = vadd.f32 %v524_v53, %v447_v58  ;;  %v1155_v58 = vld [vmem:[%s1972_s0 + $0x38] sm:$0xff] }
 0x2c2   :  { %v485_v55 = vpop.f32.mrf.mxu0  ;;  %v526_v56 = vpop.f32.mrf.mxu1 }
 0x2c3   :  { %v531_v57 = vmul.f32 0.5, %v484_v54  ;;  %v486_v59 = vadd.f32 %v485_v55, %v446_v50  ;;  %v527_v37 = vadd.f32 %v526_v56, %v448_v36 }
 0x2c4   :  { %v487_v60 = vpop.f32.mrf.mxu0  ;;  %v528_v61 = vpop.f32.mrf.mxu1 }
 0x2c5   :  { %1238 = vtanh.f32 %v531_v57  ;;  %v535_v62 = vmul.f32 0.5, %v486_v59  ;;  %v540_v38 = vmul.f32 0.5, %v527_v37 }
 0x2c6   :  { %v488_v63 = vpop.f32.mrf.mxu0  ;;  %v529_v32 = vpop.f32.mrf.mxu1 }
 0x2c7   :  { %1240 = vtanh.f32 %v535_v62  ;;  %v557_v32 = vunpack.c.l.bf16 %v1155_v58 }
 0x2c8   :  { %1242 = vtanh.f32 %v525_v34 }
 0x2c9   :  { %1244 = vtanh.f32 %v540_v38 }
 0x2d2   :  { %v1239_v39 = vpop.eup %1238 }
 0x2d3   :  { %v533_v40 = vmul.f32 0.5, %v1239_v39 }
 0x2d4   :  { %v1241_v41 = vpop.eup %1240 }
 0x2d5   :  { %v534_v43 = vadd.f32 0.5, %v533_v40  ;;  %v537_v44 = vmul.f32 0.5, %v1241_v41  ;;  %v1243_v46 = vpop.eup %1242 }
 0x2d6   :  { %v1245_v49 = vpop.eup %1244 }
 0x2d7   :  { %v538_v45 = vadd.f32 0.5, %v537_v44  ;;  %v545_v48 = vmul.f32 %v1243_v46, %v534_v43  ;;  %v542_v50 = vmul.f32 0.5, %v1245_v49  ;;  %v558_v43 = vunpack.c.h.bf16 %v1155_v58 }
 0x2d9   :  { %v544_v47 = vmul.f32 %v538_v45, %v1655_v42  ;;  %v543_v51 = vadd.f32 0.5, %v542_v50  ;;  %v1154_v42 = vld [vmem:[%s1972_s0 + $0x30] sm:$0xff] }
 0x2da   :  { %v555_v55 = vunpack.c.l.bf16 %v1154_v42  ;;  %v556_v56 = vunpack.c.h.bf16 %v1154_v42 }
 0x2db   :  { %v1702_v35 = vadd.f32 %v545_v48, %v544_v47 }
 0x2dd   :  { %1246 = vtanh.f32 %v1702_v35 }
 0x2ea   :  { %v1247_v52 = vpop.eup %1246 }
 0x2eb   :  { %v548_v53 = vmul.f32 %v1247_v52, %v543_v51 }
 0x2ed   :  { %v549_v54 = vpack.c.bf16 %v548_v53, %v548_v53 }
 0x2ef   :  { %1153 = vst [vmem:[%s1974_s4 + $0x8] sm:$0xf] %v549_v54  ;;  %592 = vmatmul.mubr.bf16.vlgmr.msra.gmra.mxu0 %v549_v54  ;;  %633 = vmatmul.mubr.bf16.vlgmr.msra.gmra.mxu1 %v549_v54 }
 0x2f0   :  { %670 = vmatpush1.bf16.msra.mxu0 %v1376_v2  ;;  %711 = vmatpush1.bf16.msra.mxu1 %v1387_v4 }
 0x2f1   :  { %671 = vmatprep.subr.bf16.mxu0 %v1393_v5  ;;  %712 = vmatprep.subr.bf16.mxu1 %v1404_v7 }
 0x2f2   :  { %701 = vmatprep.mubr.bf16.mxu0 %v1330_v1  ;;  %742 = vmatprep.mubr.bf16.mxu1 %v1330_v1 }
 0x2f4   :  { %672 = vmatpush1.bf16.msra.mxu0 %v1398_v6  ;;  %713 = vmatpush1.bf16.msra.mxu1 %v1411_v8 }
 0x2f5   :  { %673 = vmatprep.subr.bf16.mxu0 %v1417_v9  ;;  %714 = vmatprep.subr.bf16.mxu1 %v1428_v11 }
 0x2f8   :  { %674 = vmatpush1.bf16.msra.mxu0 %v1423_v10  ;;  %715 = vmatpush1.bf16.msra.mxu1 %v1440_v13 }
 0x2f9   :  { %675 = vmatprep.subr.bf16.mxu0 %v1434_v12  ;;  %716 = vmatprep.subr.bf16.mxu1 %v1446_v14 }
 0x2fc   :  { %676 = vmatpush1.bf16.msra.mxu0 %v1452_v15  ;;  %717 = vmatpush1.bf16.msra.mxu1 %v1464_v17 }
 0x2fd   :  { %677 = vmatprep.subr.bf16.mxu0 %v1458_v16  ;;  %718 = vmatprep.subr.bf16.mxu1 %v1470_v18 }
 0x300   :  { %678 = vmatpush1.bf16.msra.mxu0 %v1476_v19  ;;  %719 = vmatpush1.bf16.msra.mxu1 %v1488_v21 }
 0x301   :  { %679 = vmatprep.subr.bf16.mxu0 %v1482_v20  ;;  %720 = vmatprep.subr.bf16.mxu1 %v1494_v22 }
 0x304   :  { %680 = vmatpush1.bf16.msra.mxu0 %v1500_v23  ;;  %721 = vmatpush1.bf16.msra.mxu1 %v1512_v25 }
 0x305   :  { %681 = vmatprep.subr.bf16.mxu0 %v1506_v24  ;;  %722 = vmatprep.subr.bf16.mxu1 %v1518_v26 }
 0x308   :  { %682 = vmatpush1.bf16.msra.mxu0 %v1524_v27  ;;  %723 = vmatpush1.bf16.msra.mxu1 %v1536_v29 }
 0x309   :  { %683 = vmatprep.subr.bf16.mxu0 %v1530_v28  ;;  %724 = vmatprep.subr.bf16.mxu1 %v1542_v30 }
 0x30c   :  { %684 = vmatpush1.bf16.msra.mxu0 %v1548_v31  ;;  %725 = vmatpush1.bf16.msra.mxu1 %v1558_v33 }
 0x30d   :  { %779 = vmatprep.subr.bf16.mxu0 %v1369_v0  ;;  %820 = vmatprep.subr.bf16.mxu1 %v1382_v3 }
 0x3af   :  { %v593_v57 = vpop.f32.mrf.mxu0  ;;  %v634_v59 = vpop.f32.mrf.mxu1 }
 0x3b0   :  { %v594_v60 = vadd.f32 %v593_v57, %v555_v55  ;;  %v635_v41 = vadd.f32 %v634_v59, %v557_v32  ;;  %v1158_v32 = vld [vmem:[%s1972_s0 + $0x48] sm:$0xff] }
 0x3b1   :  { %v595_v61 = vpop.f32.mrf.mxu0  ;;  %v636_v62 = vpop.f32.mrf.mxu1 }
 0x3b2   :  { %v641_v63 = vmul.f32 0.5, %v594_v60  ;;  %v596_v34 = vadd.f32 %v595_v61, %v556_v56  ;;  %v637_v44 = vadd.f32 %v636_v62, %v558_v43 }
 0x3b3   :  { %v597_v36 = vpop.f32.mrf.mxu0  ;;  %v638_v37 = vpop.f32.mrf.mxu1 }
 0x3b4   :  { %1248 = vtanh.f32 %v641_v63  ;;  %v645_v38 = vmul.f32 0.5, %v596_v34  ;;  %v650_v45 = vmul.f32 0.5, %v637_v44 }
 0x3b5   :  { %v598_v39 = vpop.f32.mrf.mxu0  ;;  %v639_v40 = vpop.f32.mrf.mxu1 }
 0x3b6   :  { %1250 = vtanh.f32 %v645_v38  ;;  %v667_v40 = vunpack.c.l.bf16 %v1158_v32 }
 0x3b7   :  { %1252 = vtanh.f32 %v635_v41 }
 0x3b8   :  { %1254 = vtanh.f32 %v650_v45 }
 0x3c1   :  { %v1249_v46 = vpop.eup %1248 }
 0x3c2   :  { %v643_v47 = vmul.f32 0.5, %v1249_v46 }
 0x3c3   :  { %v1251_v48 = vpop.eup %1250 }
 0x3c4   :  { %v644_v49 = vadd.f32 0.5, %v643_v47  ;;  %v647_v50 = vmul.f32 0.5, %v1251_v48  ;;  %v1253_v52 = vpop.eup %1252  ;;  %v668_v47 = vunpack.c.h.bf16 %v1158_v32 }
 0x3c5   :  { %v1255_v55 = vpop.eup %1254 }
 0x3c6   :  { %v648_v51 = vadd.f32 0.5, %v647_v50  ;;  %v655_v54 = vmul.f32 %v1253_v52, %v644_v49  ;;  %v652_v56 = vmul.f32 0.5, %v1255_v55 }
 0x3c8   :  { %v654_v53 = vmul.f32 %v648_v51, %v1702_v35  ;;  %v653_v57 = vadd.f32 0.5, %v652_v56  ;;  %v1157_v35 = vld [vmem:[%s1972_s0 + $0x40] sm:$0xff] }
 0x3c9   :  { %v665_v61 = vunpack.c.l.bf16 %v1157_v35  ;;  %v666_v62 = vunpack.c.h.bf16 %v1157_v35 }
 0x3ca   :  { %v1749_v42 = vadd.f32 %v655_v54, %v654_v53 }
 0x3cc   :  { %1256 = vtanh.f32 %v1749_v42 }
 0x3d9   :  { %v1257_v58 = vpop.eup %1256 }
 0x3da   :  { %v658_v59 = vmul.f32 %v1257_v58, %v653_v57 }
 0x3dc   :  { %v659_v60 = vpack.c.bf16 %v658_v59, %v658_v59 }
 0x3de   :  { %1156 = vst [vmem:[%s1974_s4 + $0xc] sm:$0xf] %v659_v60  ;;  %702 = vmatmul.mubr.bf16.vlgmr.msra.gmra.mxu0 %v659_v60  ;;  %743 = vmatmul.mubr.bf16.vlgmr.msra.gmra.mxu1 %v659_v60 }
 0x3df   :  { %780 = vmatpush1.bf16.msra.mxu0 %v1376_v2  ;;  %821 = vmatpush1.bf16.msra.mxu1 %v1387_v4 }
 0x3e0   :  { %781 = vmatprep.subr.bf16.mxu0 %v1393_v5  ;;  %822 = vmatprep.subr.bf16.mxu1 %v1404_v7 }
 0x3e1   :  { %811 = vmatprep.mubr.bf16.mxu0 %v1330_v1  ;;  %852 = vmatprep.mubr.bf16.mxu1 %v1330_v1 }
 0x3e3   :  { %782 = vmatpush1.bf16.msra.mxu0 %v1398_v6  ;;  %823 = vmatpush1.bf16.msra.mxu1 %v1411_v8 }
 0x3e4   :  { %783 = vmatprep.subr.bf16.mxu0 %v1417_v9  ;;  %824 = vmatprep.subr.bf16.mxu1 %v1428_v11 }
 0x3e7   :  { %784 = vmatpush1.bf16.msra.mxu0 %v1423_v10  ;;  %825 = vmatpush1.bf16.msra.mxu1 %v1440_v13 }
 0x3e8   :  { %785 = vmatprep.subr.bf16.mxu0 %v1434_v12  ;;  %826 = vmatprep.subr.bf16.mxu1 %v1446_v14 }
 0x3eb   :  { %786 = vmatpush1.bf16.msra.mxu0 %v1452_v15  ;;  %827 = vmatpush1.bf16.msra.mxu1 %v1464_v17 }
 0x3ec   :  { %787 = vmatprep.subr.bf16.mxu0 %v1458_v16  ;;  %828 = vmatprep.subr.bf16.mxu1 %v1470_v18 }
 0x3ef   :  { %788 = vmatpush1.bf16.msra.mxu0 %v1476_v19  ;;  %829 = vmatpush1.bf16.msra.mxu1 %v1488_v21 }
 0x3f0   :  { %789 = vmatprep.subr.bf16.mxu0 %v1482_v20  ;;  %830 = vmatprep.subr.bf16.mxu1 %v1494_v22 }
 0x3f3   :  { %790 = vmatpush1.bf16.msra.mxu0 %v1500_v23  ;;  %831 = vmatpush1.bf16.msra.mxu1 %v1512_v25 }
 0x3f4   :  { %791 = vmatprep.subr.bf16.mxu0 %v1506_v24  ;;  %832 = vmatprep.subr.bf16.mxu1 %v1518_v26 }
 0x3f7   :  { %792 = vmatpush1.bf16.msra.mxu0 %v1524_v27  ;;  %833 = vmatpush1.bf16.msra.mxu1 %v1536_v29 }
 0x3f8   :  { %793 = vmatprep.subr.bf16.mxu0 %v1530_v28  ;;  %834 = vmatprep.subr.bf16.mxu1 %v1542_v30 }
 0x3fb   :  { %794 = vmatpush1.bf16.msra.mxu0 %v1548_v31  ;;  %835 = vmatpush1.bf16.msra.mxu1 %v1558_v33 }
 0x3fc   :  { %889 = vmatprep.subr.bf16.mxu0 %v1369_v0  ;;  %930 = vmatprep.subr.bf16.mxu1 %v1382_v3 }
 0x49e   :  { %v703_v63 = vpop.f32.mrf.mxu0  ;;  %v744_v34 = vpop.f32.mrf.mxu1 }
 0x49f   :  { %v704_v36 = vadd.f32 %v703_v63, %v665_v61  ;;  %v745_v46 = vadd.f32 %v744_v34, %v667_v40 }
 0x4a0   :  { %v705_v37 = vpop.f32.mrf.mxu0  ;;  %v746_v38 = vpop.f32.mrf.mxu1 }
 0x4a1   :  { %v751_v39 = vmul.f32 0.5, %v704_v36  ;;  %v706_v0 = vadd.f32 %v705_v37, %v666_v62  ;;  %v747_v48 = vadd.f32 %v746_v38, %v668_v47  ;;  %v1305_v47 = vld [vmem:[%s1970_s1 + $0xc8] ss:$16 sps:$4 sm:$0xff]  }
 0x4a2   :  { %v707_v41 = vpop.f32.mrf.mxu0  ;;  %v748_v3 = vpop.f32.mrf.mxu1 }
 0x4a3   :  { %1258 = vtanh.f32 %v751_v39  ;;  %v755_v43 = vmul.f32 0.5, %v706_v0  ;;  %v760_v49 = vmul.f32 0.5, %v747_v48  ;;  %v1300_v3 = vld [vmem:[%s1970_s1 + $0xe0] ss:$16 sps:$4 sm:$0xff]   ;;  %v1306_v48 = vld [vmem:[%s1970_s1 + $0xa4] ss:$16 sps:$4 sm:$0xff]  }
 0x4a4   :  { %v708_v44 = vpop.f32.mrf.mxu0  ;;  %v749_v45 = vpop.f32.mrf.mxu1 }
 0x4a5   :  { %1260 = vtanh.f32 %v755_v43  ;;  %v1301_v43 = vld [vmem:[%s1970_s1 + $0xe8] ss:$16 sps:$4 sm:$0xff]   ;;  %v1302_v44 = vld [vmem:[%s1970_s1 + $0xc4] ss:$16 sps:$4 sm:$0xff]   ;;  %v1303_v45 = vld [vmem:[%s1970_s1 + $0xcc] ss:$16 sps:$4 sm:$0xff]  }
 0x4a6   :  { %1262 = vtanh.f32 %v745_v46  ;;  %v1304_v46 = vld [vmem:[%s1970_s1 + $0xc0] ss:$16 sps:$4 sm:$0xff]  }
 0x4a7   :  { %1264 = vtanh.f32 %v760_v49  ;;  %v1307_v49 = vld [vmem:[%s1970_s1 + $0xac] ss:$16 sps:$4 sm:$0xff]  }
 0x4b0   :  { %v1259_v50 = vpop.eup %1258 }
 0x4b1   :  { %v753_v51 = vmul.f32 0.5, %v1259_v50  ;;  %v1309_v50 = vld [vmem:[%s1970_s1 + $0xa8] ss:$16 sps:$4 sm:$0xff]  }
 0x4b2   :  { %v1261_v52 = vpop.eup %1260 }
 0x4b3   :  { %v754_v53 = vadd.f32 0.5, %v753_v51  ;;  %v757_v54 = vmul.f32 0.5, %v1261_v52  ;;  %v1263_v56 = vpop.eup %1262  ;;  %v1310_v51 = vld [vmem:[%s1970_s1 + $0x84] ss:$16 sps:$4 sm:$0xff]   ;;  %v1311_v52 = vld [vmem:[%s1970_s1 + $0x8c] ss:$16 sps:$4 sm:$0xff]  }
 0x4b4   :  { %v1265_v60 = vpop.eup %1264 }
 0x4b5   :  { %v758_v55 = vadd.f32 0.5, %v757_v54  ;;  %v765_v58 = vmul.f32 %v1263_v56, %v754_v53  ;;  %v762_v35 = vmul.f32 0.5, %v1265_v60  ;;  %v1312_v53 = vld [vmem:[%s1970_s1 + $0x80] ss:$16 sps:$4 sm:$0xff]   ;;  %v1313_v54 = vld [vmem:[%s1970_s1 + $0x88] ss:$16 sps:$4 sm:$0xff]  }
 0x4b6   :  { %v1315_v56 = vld [vmem:[%s1970_s1 + $0x6c] ss:$16 sps:$4 sm:$0xff]  }
 0x4b7   :  { %v764_v57 = vmul.f32 %v758_v55, %v1749_v42  ;;  %v763_v61 = vadd.f32 0.5, %v762_v35  ;;  %v1314_v55 = vld [vmem:[%s1970_s1 + $0x64] ss:$16 sps:$4 sm:$0xff]   ;;  %v1319_v60 = vld [vmem:[%s1970_s1 + $0x4c] ss:$16 sps:$4 sm:$0xff]  }
 0x4b8   :  { %v1320_v35 = vld [vmem:[%s1970_s1 + $0x40] ss:$16 sps:$4 sm:$0xff]  }
 0x4b9   :  { %v1796_v59 = vadd.f32 %v765_v58, %v764_v57  ;;  %v1316_v57 = vld [vmem:[%s1970_s1 + $0x60] ss:$16 sps:$4 sm:$0xff]   ;;  %v1317_v58 = vld [vmem:[%s1970_s1 + $0x68] ss:$16 sps:$4 sm:$0xff]  }
 0x4bb   :  { %1266 = vtanh.f32 %v1796_v59 }
 0x4c8   :  { %v1267_v62 = vpop.eup %1266 }
 0x4c9   :  { %v768_v63 = vmul.f32 %v1267_v62, %v763_v61  ;;  %v1321_v61 = vld [vmem:[%s1970_s1 + $0x48] ss:$16 sps:$4 sm:$0xff]   ;;  %v1322_v62 = vld [vmem:[%s1970_s1 + $0x24] ss:$16 sps:$4 sm:$0xff]  }
 0x4cb   :  { %v769_v32 = vpack.c.bf16 %v768_v63, %v768_v63  ;;  %v1323_v63 = vld [vmem:[%s1970_s1 + $0x2c] ss:$16 sps:$4 sm:$0xff]  }
 0x4cd   :  { %1159 = vst [vmem:[%s1974_s4 + $0x10] sm:$0xf] %v769_v32  ;;  %812 = vmatmul.mubr.bf16.vlgmr.msra.gmra.mxu0 %v769_v32  ;;  %853 = vmatmul.mubr.bf16.vlgmr.msra.gmra.mxu1 %v769_v32  ;;  %v1324_v32 = vld [vmem:[%s1970_s1 + $0x20] ss:$16 sps:$4 sm:$0xff]  }
 0x4ce   :  { %890 = vmatpush1.bf16.msra.mxu0 %v1376_v2  ;;  %931 = vmatpush1.bf16.msra.mxu1 %v1387_v4  ;;  %v1298_v2 = vld [vmem:[%s1970_s1 + $0xe4] ss:$16 sps:$4 sm:$0xff]   ;;  %v1299_v4 = vld [vmem:[%s1970_s1 + $0xec] ss:$16 sps:$4 sm:$0xff]  }
 0x4cf   :  { %891 = vmatprep.subr.bf16.mxu0 %v1393_v5  ;;  %932 = vmatprep.subr.bf16.mxu1 %v1404_v7  ;;  %v1160_v5 = vld [vmem:[%s1972_s0 + $0x50] sm:$0xff] }
 0x4d0   :  { %921 = vmatprep.mubr.bf16.mxu0 %v1330_v1  ;;  %962 = vmatprep.mubr.bf16.mxu1 %v1330_v1  ;;  %v776_v7 = vunpack.c.h.bf16 %v1160_v5 }
 0x4d2   :  { %892 = vmatpush1.bf16.msra.mxu0 %v1398_v6  ;;  %933 = vmatpush1.bf16.msra.mxu1 %v1411_v8  ;;  %v775_v6 = vunpack.c.l.bf16 %v1160_v5  ;;  %v1327_v5 = vld [vmem:[%s1970_s1 + $0xc] ss:$16 sps:$4 sm:$0xff]  }
 0x4d3   :  { %893 = vmatprep.subr.bf16.mxu0 %v1417_v9  ;;  %934 = vmatprep.subr.bf16.mxu1 %v1428_v11  ;;  %v1161_v9 = vld [vmem:[%s1972_s0 + $0x58] sm:$0xff] }
 0x4d6   :  { %894 = vmatpush1.bf16.msra.mxu0 %v1423_v10  ;;  %935 = vmatpush1.bf16.msra.mxu1 %v1440_v13 }
 0x4d7   :  { %895 = vmatprep.subr.bf16.mxu0 %v1434_v12  ;;  %936 = vmatprep.subr.bf16.mxu1 %v1446_v14 }
 0x4da   :  { %896 = vmatpush1.bf16.msra.mxu0 %v1452_v15  ;;  %937 = vmatpush1.bf16.msra.mxu1 %v1464_v17  ;;  %v777_v15 = vunpack.c.l.bf16 %v1161_v9 }
 0x4db   :  { %897 = vmatprep.subr.bf16.mxu0 %v1458_v16  ;;  %938 = vmatprep.subr.bf16.mxu1 %v1470_v18 }
 0x4de   :  { %898 = vmatpush1.bf16.msra.mxu0 %v1476_v19  ;;  %939 = vmatpush1.bf16.msra.mxu1 %v1488_v21 }
 0x4df   :  { %899 = vmatprep.subr.bf16.mxu0 %v1482_v20  ;;  %940 = vmatprep.subr.bf16.mxu1 %v1494_v22 }
 0x4e2   :  { %900 = vmatpush1.bf16.msra.mxu0 %v1500_v23  ;;  %941 = vmatpush1.bf16.msra.mxu1 %v1512_v25  ;;  %v778_v23 = vunpack.c.h.bf16 %v1161_v9 }
 0x4e3   :  { %901 = vmatprep.subr.bf16.mxu0 %v1506_v24  ;;  %942 = vmatprep.subr.bf16.mxu1 %v1518_v26 }
 0x4e6   :  { %902 = vmatpush1.bf16.msra.mxu0 %v1524_v27  ;;  %943 = vmatpush1.bf16.msra.mxu1 %v1536_v29 }
 0x4e7   :  { %903 = vmatprep.subr.bf16.mxu0 %v1530_v28  ;;  %944 = vmatprep.subr.bf16.mxu1 %v1542_v30 }
 0x4ea   :  { %904 = vmatpush1.bf16.msra.mxu0 %v1548_v31  ;;  %945 = vmatpush1.bf16.msra.mxu1 %v1558_v33 }
 0x4eb   :  { %999 = vmatprep.subr.bf16.mxu0 %v1298_v2  ;;  %1040 = vmatprep.subr.bf16.mxu1 %v1299_v4  ;;  %v1325_v2 = vld [vmem:[%s1970_s1 + $0x28] ss:$16 sps:$4 sm:$0xff]   ;;  %v1326_v4 = vld [vmem:[%s1970_s1 + $0x4] ss:$16 sps:$4 sm:$0xff]  }
 0x58d   :  { %v813_v8 = vpop.f32.mrf.mxu0  ;;  %v854_v10 = vpop.f32.mrf.mxu1 }
 0x58e   :  { %v814_v11 = vadd.f32 %v813_v8, %v775_v6  ;;  %v855_v22 = vadd.f32 %v854_v10, %v777_v15  ;;  %v1328_v6 = vld [vmem:[%s1970_s1] ss:$16 sps:$4 sm:$0xff]  }
 0x58f   :  { %v815_v12 = vpop.f32.mrf.mxu0  ;;  %v856_v13 = vpop.f32.mrf.mxu1  ;;  %v1163_v8 = vld [vmem:[%s1972_s0 + $0x60] sm:$0xff] }
 0x590   :  { %v861_v14 = vmul.f32 0.5, %v814_v11  ;;  %v816_v16 = vadd.f32 %v815_v12, %v776_v7  ;;  %v857_v24 = vadd.f32 %v856_v13, %v778_v23  ;;  %v1329_v7 = vld [vmem:[%s1970_s1 + $0x8] ss:$16 sps:$4 sm:$0xff]   ;;  %v885_v9 = vunpack.c.l.bf16 %v1163_v8 }
 0x591   :  { %v817_v17 = vpop.f32.mrf.mxu0  ;;  %v858_v18 = vpop.f32.mrf.mxu1  ;;  %v886_v10 = vunpack.c.h.bf16 %v1163_v8  ;;  %v1164_v12 = vld [vmem:[%s1972_s0 + $0x68] sm:$0xff] }
 0x592   :  { %1268 = vtanh.f32 %v861_v14  ;;  %v865_v19 = vmul.f32 0.5, %v816_v16  ;;  %v870_v25 = vmul.f32 0.5, %v857_v24  ;;  %v887_v18 = vunpack.c.l.bf16 %v1164_v12 }
 0x593   :  { %v818_v20 = vpop.f32.mrf.mxu0  ;;  %v859_v21 = vpop.f32.mrf.mxu1 }
 0x594   :  { %1270 = vtanh.f32 %v865_v19 }
 0x595   :  { %1272 = vtanh.f32 %v855_v22 }
 0x596   :  { %1274 = vtanh.f32 %v870_v25 }
 0x59f   :  { %v1269_v26 = vpop.eup %1268 }
 0x5a0   :  { %v863_v27 = vmul.f32 0.5, %v1269_v26  ;;  %v888_v26 = vunpack.c.h.bf16 %v1164_v12 }
 0x5a1   :  { %v1271_v28 = vpop.eup %1270 }
 0x5a2   :  { %v864_v29 = vadd.f32 0.5, %v863_v27  ;;  %v867_v30 = vmul.f32 0.5, %v1271_v28  ;;  %v1273_v33 = vpop.eup %1272 }
 0x5a3   :  { %v1275_v37 = vpop.eup %1274 }
 0x5a4   :  { %v868_v31 = vadd.f32 0.5, %v867_v30  ;;  %v875_v34 = vmul.f32 %v1273_v33, %v864_v29  ;;  %v872_v38 = vmul.f32 0.5, %v1275_v37 }
 0x5a6   :  { %v874_v42 = vmul.f32 %v868_v31, %v1796_v59  ;;  %v873_v39 = vadd.f32 0.5, %v872_v38  ;;  %v1318_v59 = vld [vmem:[%s1970_s1 + $0x44] ss:$16 sps:$4 sm:$0xff]  }
 0x5a8   :  { %v1847_v36 = vadd.f32 %v875_v34, %v874_v42 }
 0x5aa   :  { %1276 = vtanh.f32 %v1847_v36 }
 0x5b7   :  { %v1277_v40 = vpop.eup %1276 }
 0x5b8   :  { %v878_v0 = vmul.f32 %v1277_v40, %v873_v39 }
 0x5ba   :  { %v879_v41 = vpack.c.bf16 %v878_v0, %v878_v0 }
 0x5bc   :  { %1162 = vst [vmem:[%s1974_s4 + $0x14] sm:$0xf] %v879_v41  ;;  %922 = vmatmul.mubr.bf16.vlgmr.msra.gmra.mxu0 %v879_v41  ;;  %963 = vmatmul.mubr.bf16.vlgmr.msra.gmra.mxu1 %v879_v41 }
 0x5bd   :  { %1000 = vmatpush1.bf16.msra.mxu0 %v1300_v3  ;;  %1041 = vmatpush1.bf16.msra.mxu1 %v1301_v43 }
 0x5be   :  { %1001 = vmatprep.subr.bf16.mxu0 %v1302_v44  ;;  %1042 = vmatprep.subr.bf16.mxu1 %v1303_v45 }
 0x5bf   :  { %1031 = vmatprep.mubr.bf16.mxu0 %v1330_v1  ;;  %1072 = vmatprep.mubr.bf16.mxu1 %v1330_v1  ;;  %v1308_v1 = vld [vmem:[%s1970_s1 + $0xa0] ss:$16 sps:$4 sm:$0xff]  }
 0x5c1   :  { %1002 = vmatpush1.bf16.msra.mxu0 %v1304_v46  ;;  %1043 = vmatpush1.bf16.msra.mxu1 %v1305_v47  ;;  %v1166_v46 = vld [vmem:[%s1972_s0 + $0x70] sm:$0xff] }
 0x5c2   :  { %1003 = vmatprep.subr.bf16.mxu0 %v1306_v48  ;;  %1044 = vmatprep.subr.bf16.mxu1 %v1307_v49  ;;  %v996_v47 = vunpack.c.h.bf16 %v1166_v46  ;;  %v1167_v49 = vld [vmem:[%s1972_s0 + $0x78] sm:$0xff] }
 0x5c5   :  { %1004 = vmatpush1.bf16.msra.mxu0 %v1308_v1  ;;  %1045 = vmatpush1.bf16.msra.mxu1 %v1309_v50 }
 0x5c6   :  { %1005 = vmatprep.subr.bf16.mxu0 %v1310_v51  ;;  %1046 = vmatprep.subr.bf16.mxu1 %v1311_v52 }
 0x5c9   :  { %1006 = vmatpush1.bf16.msra.mxu0 %v1312_v53  ;;  %1047 = vmatpush1.bf16.msra.mxu1 %v1313_v54  ;;  %v997_v54 = vunpack.c.l.bf16 %v1167_v49 }
 0x5ca   :  { %1007 = vmatprep.subr.bf16.mxu0 %v1314_v55  ;;  %1048 = vmatprep.subr.bf16.mxu1 %v1315_v56 }
 0x5cd   :  { %1008 = vmatpush1.bf16.msra.mxu0 %v1316_v57  ;;  %1049 = vmatpush1.bf16.msra.mxu1 %v1317_v58 }
 0x5ce   :  { %1009 = vmatprep.subr.bf16.mxu0 %v1318_v59  ;;  %1050 = vmatprep.subr.bf16.mxu1 %v1319_v60 }
 0x5d1   :  { %1010 = vmatpush1.bf16.msra.mxu0 %v1320_v35  ;;  %1051 = vmatpush1.bf16.msra.mxu1 %v1321_v61  ;;  %v998_v61 = vunpack.c.h.bf16 %v1167_v49 }
 0x5d2   :  { %1011 = vmatprep.subr.bf16.mxu0 %v1322_v62  ;;  %1052 = vmatprep.subr.bf16.mxu1 %v1323_v63 }
 0x5d5   :  { %1012 = vmatpush1.bf16.msra.mxu0 %v1324_v32  ;;  %1053 = vmatpush1.bf16.msra.mxu1 %v1325_v2 }
 0x5d6   :  { %1013 = vmatprep.subr.bf16.mxu0 %v1326_v4  ;;  %1054 = vmatprep.subr.bf16.mxu1 %v1327_v5 }
 0x5d9   :  { %1014 = vmatpush1.bf16.msra.mxu0 %v1328_v6  ;;  %1055 = vmatpush1.bf16.msra.mxu1 %v1329_v7 }
 0x67c   :  { %v923_v11 = vpop.f32.mrf.mxu0  ;;  %v964_v13 = vpop.f32.mrf.mxu1 }
 0x67d   :  { %v924_v14 = vadd.f32 %v923_v11, %v885_v9  ;;  %v965_v25 = vadd.f32 %v964_v13, %v887_v18 }
 0x67e   :  { %v925_v15 = vpop.f32.mrf.mxu0  ;;  %v966_v16 = vpop.f32.mrf.mxu1 }
 0x67f   :  { %v971_v17 = vmul.f32 0.5, %v924_v14  ;;  %v926_v19 = vadd.f32 %v925_v15, %v886_v10  ;;  %v967_v27 = vadd.f32 %v966_v16, %v888_v26 }
 0x680   :  { %v927_v20 = vpop.f32.mrf.mxu0  ;;  %v968_v21 = vpop.f32.mrf.mxu1 }
 0x681   :  { %1278 = vtanh.f32 %v971_v17  ;;  %v975_v22 = vmul.f32 0.5, %v926_v19  ;;  %v980_v28 = vmul.f32 0.5, %v967_v27 }
 0x682   :  { %v928_v23 = vpop.f32.mrf.mxu0  ;;  %v969_v24 = vpop.f32.mrf.mxu1 }
 0x683   :  { %1280 = vtanh.f32 %v975_v22 }
 0x684   :  { %1282 = vtanh.f32 %v965_v25 }
 0x685   :  { %1284 = vtanh.f32 %v980_v28 }
 0x68e   :  { %v1279_v29 = vpop.eup %1278 }
 0x68f   :  { %v973_v30 = vmul.f32 0.5, %v1279_v29 }
 0x690   :  { %v1281_v31 = vpop.eup %1280 }
 0x691   :  { %v974_v33 = vadd.f32 0.5, %v973_v30  ;;  %v977_v42 = vmul.f32 0.5, %v1281_v31  ;;  %v1283_v37 = vpop.eup %1282 }
 0x692   :  { %v1285_v0 = vpop.eup %1284 }
 0x693   :  { %v978_v34 = vadd.f32 0.5, %v977_v42  ;;  %v985_v39 = vmul.f32 %v1283_v37, %v974_v33  ;;  %v982_v41 = vmul.f32 0.5, %v1285_v0 }
 0x695   :  { %v984_v38 = vmul.f32 %v978_v34, %v1847_v36  ;;  %v983_v3 = vadd.f32 0.5, %v982_v41  ;;  %v995_v36 = vunpack.c.l.bf16 %v1166_v46 }
 0x697   :  { %v986_v40 = vadd.f32 %v985_v39, %v984_v38 }
 0x699   :  { %1286 = vtanh.f32 %v986_v40 }
 0x6a6   :  { %v1287_v43 = vpop.eup %1286 }
 0x6a7   :  { %v988_v44 = vmul.f32 %v1287_v43, %v983_v3 }
 0x6a9   :  { %v989_v45 = vpack.c.bf16 %v988_v44, %v988_v44 }
 0x6ab   :  { %1165 = vst [vmem:[%s1974_s4 + $0x18] sm:$0xf] %v989_v45  ;;  %1032 = vmatmul.mubr.bf16.vlgmr.msra.gmra.mxu0 %v989_v45  ;;  %1073 = vmatmul.mubr.bf16.vlgmr.msra.gmra.mxu1 %v989_v45 }
 0x76b   :  { %v1033_v48 = vpop.f32.mrf.mxu0  ;;  %v1074_v1 = vpop.f32.mrf.mxu1 }
 0x76c   :  { %v1034_v50 = vadd.f32 %v1033_v48, %v995_v36  ;;  %v1075_v35 = vadd.f32 %v1074_v1, %v997_v54 }
 0x76d   :  { %v1035_v51 = vpop.f32.mrf.mxu0  ;;  %v1076_v52 = vpop.f32.mrf.mxu1 }
 0x76e   :  { %v1081_v53 = vmul.f32 0.5, %v1034_v50  ;;  %v1036_v55 = vadd.f32 %v1035_v51, %v996_v47  ;;  %v1077_v62 = vadd.f32 %v1076_v52, %v998_v61 }
 0x76f   :  { %v1037_v56 = vpop.f32.mrf.mxu0  ;;  %v1078_v57 = vpop.f32.mrf.mxu1 }
 0x770   :  { %1288 = vtanh.f32 %v1081_v53  ;;  %v1085_v58 = vmul.f32 0.5, %v1036_v55  ;;  %v1090_v63 = vmul.f32 0.5, %v1077_v62 }
 0x771   :  { %v1038_v59 = vpop.f32.mrf.mxu0  ;;  %v1079_v60 = vpop.f32.mrf.mxu1 }
 0x772   :  { %1290 = vtanh.f32 %v1085_v58 }
 0x773   :  { %1292 = vtanh.f32 %v1075_v35 }
 0x774   :  { %1294 = vtanh.f32 %v1090_v63 }
 0x77d   :  { %v1289_v32 = vpop.eup %1288 }
 0x77e   :  { %v1083_v2 = vmul.f32 0.5, %v1289_v32 }
 0x77f   :  { %v1291_v4 = vpop.eup %1290 }
 0x780   :  { %v1084_v5 = vadd.f32 0.5, %v1083_v2  ;;  %v1087_v6 = vmul.f32 0.5, %v1291_v4  ;;  %v1293_v8 = vpop.eup %1292 }
 0x781   :  { %v1295_v12 = vpop.eup %1294 }
 0x782   :  { %v1088_v7 = vadd.f32 0.5, %v1087_v6  ;;  %v1095_v10 = vmul.f32 %v1293_v8, %v1084_v5  ;;  %v1092_v13 = vmul.f32 0.5, %v1295_v12 }
 0x784   :  { %v1094_v9 = vmul.f32 %v1088_v7, %v986_v40  ;;  %v1093_v14 = vadd.f32 0.5, %v1092_v13 }
 0x786   :  { %v1096_v11 = vadd.f32 %v1095_v10, %v1094_v9 }
 0x788   :  { %1296 = vtanh.f32 %v1096_v11  ;;  %1103 = vst [vmem:[%s1975_s6] sm:$0xff] %v1096_v11 }
 0x795   :  { %v1297_v15 = vpop.eup %1296 }
 0x796   :  { %v1098_v16 = vmul.f32 %v1297_v15, %v1093_v14 }
 0x798   :  { %v1099_v17 = vpack.c.bf16 %v1098_v16, %v1098_v16  ;;  %1102 = vst [vmem:[%s1976_s5] sm:$0xff] %v1098_v16 }
 0x79a   :  { %1168 = vst [vmem:[%s1974_s4 + $0x1c] sm:$0xf] %v1099_v17 }

</bundles_post_ra>
